<compile_context>
chip_gen: v6e
topology: v6e:2x2x1
jax: 0.10.0
libtpu: 0.0.40
codegen_flags: <defaults>
</compile_context>

<pallas_src>
import functools
import math

import jax
import jax.numpy as jnp
from jax.experimental import pallas as pl
from jax.experimental.pallas import tpu as pltpu


def _round_up(x, m):
    return ((x + m - 1) // m) * m


def _num_tensorcores_per_chip():
    """2 TensorCores/chip on v7x, otherwise 1 (v5e / v6e)."""
    try:
        kind = jax.devices()[0].device_kind.lower()
    except Exception:
        return 1
    return 2 if ("v7" in kind or "7x" in kind) else 1


# ----------------------------- Pallas kernel --------------------------------
def ensemble_head_kernel(feat_ref, w_ref, b_ref, out_ref, *, t_valid):
    """One grid step processes TB batch rows.

    feat_ref : (TB, 4, Tp, C) bf16  first AvgPool2d((4,1)) window of freq bins
    w_ref    : (C, Lp)        bf16  MeanPooling 1x1 conv weight, pre-scaled by
                                    0.25 (freq-pool divisor), zero-padded cols
    b_ref    : (1, Lp)        f32   conv bias (zero-padded)
    out_ref  : (TB, Lp)       f32
    """
    tb, _, tp, c = feat_ref.shape
    lp = w_ref.shape[1]

    # AvgPool2d((4,1)) over frequency bins: plain sum (f32); the 1/4 divisor
    # lives in w_ref.  Only window 0 is ever consumed downstream because of
    # `cla[:, :, :, 0]` in the reference MeanPooling.
    pooled = jnp.sum(feat_ref[...].astype(jnp.float32), axis=1)      # (TB, Tp, C)

    # 1x1 Conv2d == channel matmul; batch folded into the MXU M dimension.
    # TB, Tp are multiples of 8 and C a multiple of 128 -> free reshapes.
    x2d = pooled.astype(jnp.bfloat16).reshape(tb * tp, c)            # (TB*Tp, C)
    logits = jnp.dot(x2d, w_ref[...],
                     preferred_element_type=jnp.float32)             # (TB*Tp, Lp)
    cla = jnp.maximum(logits + b_ref[...], 0.0).reshape(tb, tp, lp)  # ReLU, f32

    # torch.mean(cla, dim=2): mean over the *valid* time steps only.
    if t_valid != tp:                                 # time axis was padded
        mask = jax.lax.broadcasted_iota(jnp.int32, (tb, tp, lp), 1) < t_valid
        cla = jnp.where(mask, cla, 0.0)
    out_ref[...] = jnp.sum(cla, axis=1) * (1.0 / t_valid)            # (TB, Lp)


def effnet_mean_ensemble_head(feat, w, b, *, tb=None):
    """feat: (B, F', T', C) channels-last; w: (C, L); b: (L,) -> (B, L)."""
    B, Fp, T, C = feat.shape
    assert Fp >= 4, "AvgPool2d((4,1)) needs at least 4 frequency bins"
    L = w.shape[1]

    # bf16 feature DMA: halves HBM traffic of the dominant operand.
    if feat.dtype != jnp.bfloat16:
        feat = feat.astype(jnp.bfloat16)

    # Lane-dense label dim (multiple of 128): unmasked MXU columns and stores.
    Lp = _round_up(L, 128)
    # Fold the AvgPool2d((4,1)) divisor into the padded bf16 weight once.
    w_p = jnp.zeros((C, Lp), jnp.bfloat16).at[:, :L].set(
        (0.25 * w).astype(jnp.bfloat16))
    b_p = jnp.zeros((1, Lp), jnp.float32).at[:, :L].set(b.astype(jnp.float32))

    # Sublane-dense time axis so in-kernel reshapes are view-like.
    Tp = _round_up(T, 8)

    # --- batch tile: VMEM-budgeted and generation-aware ----------------------
    feat_row_bytes = 4 * Tp * C * 2                  # bf16 bytes per batch row
    w_bytes = C * Lp * 2 + Lp * 4                    # single-buffered weight+bias
    out_row_bytes = Lp * 4
    budget = 24 << 20                                # conservative for v7x (64 MiB)
    max_tb = max(8, (((budget - w_bytes)
                      // (2 * feat_row_bytes + 2 * out_row_bytes)) // 8) * 8)
    if tb is None:
        if _num_tensorcores_per_chip() >= 2 and B > 8:
            # v7x: keep an even number of grid steps so the "parallel" axis
            # shards evenly over both TensorCores.
            tb = min(_round_up(pl.cdiv(B, 2), 8), max_tb)
        else:
            # Single-TC chips (v5e/v6e): one grid step whenever the tile fits.
            tb = min(_round_up(B, 8), max_tb)
    tb = max(8, _round_up(tb, 8))
    G = pl.cdiv(B, tb)
    Bp = G * tb

    if (Bp, Tp) != (B, T):
        feat = jnp.pad(feat, ((0, Bp - B), (0, 0), (0, Tp - T), (0, 0)))

    needed_vmem = 2 * tb * feat_row_bytes + w_bytes + 2 * tb * out_row_bytes
    vmem_limit = int(min(64 << 20, max(2 * needed_vmem + (2 << 20), 32 << 20)))

    cost = pl.CostEstimate(
        flops=2 * Bp * Tp * C * Lp,
        transcendentals=0,
        bytes_accessed=Bp * 4 * Tp * C * 2 + C * Lp * 2 + Lp * 4 + Bp * Lp * 4,
    )

    out = pl.pallas_call(
        functools.partial(ensemble_head_kernel, t_valid=T),
        out_shape=jax.ShapeDtypeStruct((Bp, Lp), jnp.float32),
        grid=(G,),
        in_specs=[
            # Only the first 4-freq-bin pooling window is needed (cla[:,:,:,0]).
            pl.BlockSpec((tb, 4, Tp, C), lambda i: (i, 0, 0, 0)),
            # Grid-invariant weight / bias: single-buffered to save VMEM.
            pl.BlockSpec((C, Lp), lambda i: (0, 0),
                         pipeline_mode=pl.Buffered(1)),
            pl.BlockSpec((1, Lp), lambda i: (0, 0),
                         pipeline_mode=pl.Buffered(1)),
        ],
        out_specs=pl.BlockSpec((tb, Lp), lambda i: (i, 0)),
        compiler_params=pltpu.CompilerParams(
            dimension_semantics=("parallel",),
            vmem_limit_bytes=vmem_limit,
        ),
        cost_estimate=cost,
    )(feat, w_p, b_p)

    return out[:B, :L]


# ----------------------------- plain-JAX glue --------------------------------
def stub_backbone(x_nchw, proj_w, proj_b, stride=4):
    """Deterministic stand-in for EfficientNet.extract_features.

    x_nchw: (B, 1, H, W) -> channels-last (B, H//stride, W//stride, C).
    """
    B, _, H, W = x_nchw.shape
    p = x_nchw[:, 0].reshape(B, H // stride, stride, W // stride, stride)
    p = jnp.transpose(p, (0, 1, 3, 2, 4)).reshape(
        B, H // stride, W // stride, stride * stride)
    return jax.nn.relu(jnp.einsum("bhwp,pc->bhwc", p, proj_w) + proj_b)


def effnet_mean_ensemble_forward(x, params):
    """Mirrors EffNetMeanEnsemble.forward semantics."""
    if x.shape[2] < x.shape[1]:
        x = jnp.transpose(x, (0, 2, 1))
    if x.ndim == 3:
        x = x[:, None, :, :]                                        # (B,1,F,T) NCHW

    # TODO(synk): EfficientNet.extract_features (full MBConv backbone) has no
    # clean single-kernel Pallas equivalent; replaced by deterministic
    # patch-embedding stubs of the same rank/shape contract.
    f1 = stub_backbone(x, params["proj1_w"], params["proj1_b"])     # (B,F',T',C1)
    f2 = stub_backbone(x, params["proj2_w"], params["proj2_b"])     # (B,F',T',C2)

    feat = jnp.concatenate([f1, f2], axis=-1)                       # channels-last
    return effnet_mean_ensemble_head(feat, params["cla_w"], params["cla_b"])


def head_reference(feat, w, b):
    """Pure-JAX f32 reference of the head (avgpool -> 1x1 conv -> relu -> mean)."""
    pooled = feat[:, :4].mean(axis=1)                               # (B,T,C)
    cla = jax.nn.relu(jnp.einsum("btc,cl->btl", pooled, w) + b)
    return cla.mean(axis=1)


def init_params(key, c1, c2, patch, label_dim):
    k1, k2, k3 = jax.random.split(key, 3)
    C = c1 + c2
    # init_layer semantics for the 1x1 conv: n = n_in*1*1
    std = math.sqrt(2.0 / C)
    scale = std * math.sqrt(3.0)
    cla_w = jax.random.uniform(k3, (C, label_dim), jnp.float32, -scale, scale)
    cla_b = jnp.zeros((label_dim,), jnp.float32)
    return {
        "proj1_w": jax.random.normal(k1, (patch * patch, c1), jnp.float32) * 0.1,
        "proj1_b": jnp.zeros((c1,), jnp.float32),
        "proj2_w": jax.random.normal(k2, (patch * patch, c2), jnp.float32) * 0.1,
        "proj2_b": jnp.zeros((c2,), jnp.float32),
        "cla_w": cla_w,
        "cla_b": cla_b,
    }


if __name__ == "__main__":
    key = jax.random.PRNGKey(0)
    kx, kp = jax.random.split(key)

    # x is (batch, time_steps, freq_bins); time > freq so the forward's
    # transpose branch is exercised (freq ends up on H).  B=8, T'=16 gives a
    # single grid step with a 128x256 @ 256x640 MXU matmul.
    B, TIME, FREQ = 8, 64, 16
    C1, C2, PATCH, LABEL_DIM = 128, 128, 4, 527     # stand-ins for middim[level]

    x = jax.random.normal(kx, (B, TIME, FREQ), jnp.float32)
    params = init_params(kp, C1, C2, PATCH, LABEL_DIM)

    out = jax.block_until_ready(effnet_mean_ensemble_forward(x, params))
    assert out.shape == (B, LABEL_DIM), out.shape

    # Validate the Pallas head against a pure-JAX f32 reference.  The kernel
    # uses bf16 feature DMA and bf16 MXU operands, so tolerance is relaxed.
    x_t = jnp.transpose(x, (0, 2, 1))[:, None]                      # (B,1,F,T)
    f1 = stub_backbone(x_t, params["proj1_w"], params["proj1_b"])
    f2 = stub_backbone(x_t, params["proj2_w"], params["proj2_b"])
    feat = jnp.concatenate([f1, f2], axis=-1)
    ref = head_reference(feat, params["cla_w"], params["cla_b"])
    max_err = float(jnp.max(jnp.abs(out - ref)))
    assert jnp.allclose(out, ref, atol=5e-2, rtol=5e-2), max_err

    print("KERNEL_OK")
</pallas_src>

<mosaic_0001>
module attributes {stable_mosaic.version = 11 : i64} {
  func.func @ensemble_head_kernel(%arg0: i32, %arg1: memref<8x4x16x256xbf16, #tpu.memory_space<vmem>>, %arg2: memref<256x640xbf16, #tpu.memory_space<vmem>>, %arg3: memref<1x640xf32, #tpu.memory_space<vmem>>, %arg4: memref<8x640xf32, #tpu.memory_space<vmem>>) attributes {dimension_semantics = [#tpu.dimension_semantics<parallel>], iteration_bounds = array<i64: 1>, scalar_prefetch = 0 : i64, scratch_operands = 0 : i64, tpu.core_type = #tpu.core_type<tc>, window_params = [{transform_indices = @transform_0, window_bounds = array<i64: 8, 4, 16, 256>}, {pipeline_mode = #tpu.pipeline_mode<synchronous>, transform_indices = @transform_1, window_bounds = array<i64: 256, 640>}, {pipeline_mode = #tpu.pipeline_mode<synchronous>, transform_indices = @transform_2, window_bounds = array<i64: 1, 640>}, {transform_indices = @transform_3, window_bounds = array<i64: 8, 640>}]} {
    %c0 = arith.constant 0 : index
    %c0_0 = arith.constant 0 : index
    %c0_1 = arith.constant 0 : index
    %c0_2 = arith.constant 0 : index
    %0 = vector.load %arg1[%c0, %c0_0, %c0_1, %c0_2] : memref<8x4x16x256xbf16, #tpu.memory_space<vmem>>, vector<8x4x16x256xbf16>
    %1 = arith.extf %0 : vector<8x4x16x256xbf16> to vector<8x4x16x256xf32>
    %cst = arith.constant dense<0.000000e+00> : vector<8x16x256xf32>
    %2 = vector.multi_reduction <add>, %1, %cst [1] : vector<8x4x16x256xf32> to vector<8x16x256xf32>
    %3 = arith.truncf %2 : vector<8x16x256xf32> to vector<8x16x256xbf16>
    %4 = vector.shape_cast %3 : vector<8x16x256xbf16> to vector<128x256xbf16>
    %c0_3 = arith.constant 0 : index
    %c0_4 = arith.constant 0 : index
    %5 = vector.load %arg2[%c0_3, %c0_4] : memref<256x640xbf16, #tpu.memory_space<vmem>>, vector<256x640xbf16>
    %cst_5 = arith.constant dense<0.000000e+00> : vector<128x640xf32>
    %6 = tpu.matmul %4, %5, %cst_5 {dimension_numbers = #tpu.dot_dimension_numbers<[1], [0], [0], [1], [0, 0, 1, 1], [], []>} : vector<128x256xbf16>, vector<256x640xbf16>, vector<128x640xf32> -> vector<128x640xf32>
    %c0_6 = arith.constant 0 : index
    %c0_7 = arith.constant 0 : index
    %7 = vector.load %arg3[%c0_6, %c0_7] : memref<1x640xf32, #tpu.memory_space<vmem>>, vector<1x640xf32>
    %8 = vector.broadcast %7 : vector<1x640xf32> to vector<128x640xf32>
    %9 = arith.addf %6, %8 : vector<128x640xf32>
    %cst_8 = arith.constant 0.000000e+00 : f32
    %10 = vector.broadcast %cst_8 : f32 to vector<128x640xf32>
    %11 = arith.maximumf %9, %10 : vector<128x640xf32>
    %12 = vector.shape_cast %11 : vector<128x640xf32> to vector<8x16x640xf32>
    %cst_9 = arith.constant dense<0.000000e+00> : vector<8x640xf32>
    %13 = vector.multi_reduction <add>, %12, %cst_9 [1] : vector<8x16x640xf32> to vector<8x640xf32>
    %cst_10 = arith.constant 6.250000e-02 : f32
    %14 = vector.broadcast %cst_10 : f32 to vector<8x640xf32>
    %15 = arith.mulf %13, %14 : vector<8x640xf32>
    %c0_11 = arith.constant 0 : index
    %c0_12 = arith.constant 0 : index
    %16 = vector.load %arg4[%c0_11, %c0_12] : memref<8x640xf32, #tpu.memory_space<vmem>>, vector<8x640xf32>
    tpu.vector_store %arg4[%c0_11, %c0_12], %15 {strides = array<i32>} : memref<8x640xf32, #tpu.memory_space<vmem>>, vector<8x640xf32>,
    return
  }
  func.func @transform_0(%arg0: i32) -> (i32, i32, i32, i32) {
    %c0_i32 = arith.constant 0 : i32
    %c0_i32_0 = arith.constant 0 : i32
    %c0_i32_1 = arith.constant 0 : i32
    %c0_i32_2 = arith.constant 0 : i32
    return %arg0, %c0_i32, %c0_i32_0, %c0_i32_1 : i32, i32, i32, i32
  }
  func.func @transform_1(%arg0: i32) -> (i32, i32) {
    %c0_i32 = arith.constant 0 : i32
    %c0_i32_0 = arith.constant 0 : i32
    %c0_i32_1 = arith.constant 0 : i32
    return %c0_i32, %c0_i32_0 : i32, i32
  }
  func.func @transform_2(%arg0: i32) -> (i32, i32) {
    %c0_i32 = arith.constant 0 : i32
    %c0_i32_0 = arith.constant 0 : i32
    %c0_i32_1 = arith.constant 0 : i32
    return %c0_i32, %c0_i32_0 : i32, i32
  }
  func.func @transform_3(%arg0: i32) -> (i32, i32) {
    %c0_i32 = arith.constant 0 : i32
    %c0_i32_0 = arith.constant 0 : i32
    return %arg0, %c0_i32 : i32, i32
  }
}

</mosaic_0001>

<bundles_post_ra>
// kernel: tpu_custom_call.1
= control target key start
LH: loop header
LB: loop body
LE: loop exit
PB: predicated region body
PF: predicated region fallthrough
CT: control target
= control target key end

     0   :  { %8 = vsyncpa [#allocation3], 0  ;;  %s2749_s0 = inlined_call_operand.hbm [shape: bf16[8,4,16,256], index: 0, kind: input, shape index: {}]   ;;  %s2750_s1 = inlined_call_operand.hbm [shape: bf16[256,640], index: 1, kind: input, shape index: {}]   ;;  %s2751_s2 = inlined_call_operand.hbm [shape: f32[1,640], index: 2, kind: input, shape index: {}]   ;;  %s2752_s3 = inlined_call_operand.hbm [shape: f32[8,640], index: 3, kind: output, shape index: {}]  }
   0x1   :  { %9 = vsyncpa [#allocation6], 0 }
   0x2   :  { %10 = vsyncpa [#allocation4], 0  ;;  %s2095_s12 = smov [#allocation5]  }
   0x3   :  { %s28_s13 = sshll.u32 %s2095_s12, 4  ;;  %s29_s13 = int_to_ptr.vmem [resolvable:$true] %s28_s13 }
   0x4   :  { %s2017_s14 = scalar_lea.vmem %s29_s13, 10240  ;;  %p2022_p1 = scmp.lt.s32.totalorder %s29_s13, %s29_s13 }
   0x5   :  { %p2018_p0 = scmp.ne.s32.totalorder %s29_s13, %s2017_s14  ;;  %p2023_p2 = scmp.lt.s32.totalorder %s2017_s14, %s2017_s14 }
   0x7   :  { %p2024_p3 = por %p2023_p2, %p2022_p1 }
   0x9   :  { %p2025_p4 = pnand %p2024_p3, %p2018_p0 }
   0xb   :  { %2028 = shalt.err (!%p2025_p4)
}
   0xc   :  { %s2096_s15 = smov 320   ;;  %s2097_s16 = smov 20  }
   0xd   :  { %34 = dma.hbm_to_vmem [thread:$0]  %s2750_s1, 10240, %s29_s13, [#allocation6], %s2096_s15, %s2096_s15, %s2097_s16  }
   0xe   :  { %s2098_s19 = smov [#allocation2]  }
   0xf   :  { %s16_s20 = sshll.u32 %s2098_s19, 4  ;;  %s17_s20 = int_to_ptr.vmem [resolvable:$true] %s16_s20 }
  0x10   :  { %s2037_s21 = scalar_lea.vmem %s17_s20, 8192  ;;  %p2042_p6 = scmp.lt.s32.totalorder %s17_s20, %s17_s20 }
  0x11   :  { %p2038_p5 = scmp.ne.s32.totalorder %s17_s20, %s2037_s21  ;;  %p2043_p7 = scmp.lt.s32.totalorder %s2037_s21, %s2037_s21 }
  0x13   :  { %p2044_p8 = por %p2043_p7, %p2042_p6 }
  0x15   :  { %p2045_p9 = pnand %p2044_p8, %p2038_p5 }
  0x17   :  { %2048 = shalt.err (!%p2045_p9)
}
  0x18   :  { %s2099_s22 = smov 128   ;;  %s2100_s23 = smov 8  }
  0x19   :  { %22 = dma.hbm_to_vmem [thread:$0]  %s2749_s0, 8192, %s17_s20, [#allocation3], %s2099_s22, %s2099_s22, %s2100_s23  }
  0x1a   :  { %s2101_s26 = smov [#allocation7]  }
  0x1b   :  { %s41_s27 = sshll.u32 %s2101_s26, 4  ;;  %s42_s27 = int_to_ptr.vmem [resolvable:$true] %s41_s27 }
  0x1c   :  { %s2057_s1 = scalar_lea.vmem %s42_s27, 80  ;;  %s2061_s28 = scalar_lea.vmem %s42_s27, 96 }
  0x1d   :  { %p2058_p10 = scmp.ne.s32.totalorder %s42_s27, %s2057_s1  ;;  %p2062_p11 = scmp.lt.s32.totalorder %s42_s27, %s42_s27 }
  0x1e   :  { %p2063_p12 = scmp.lt.s32.totalorder %s2061_s28, %s2057_s1 }
  0x20   :  { %p2064_p13 = por %p2063_p12, %p2062_p11 }
  0x22   :  { %p2065_p0 = pnand %p2064_p13, %p2058_p10 }
  0x24   :  { %2068 = shalt.err (!%p2065_p0)
}
  0x25   :  { %44 = dma.hbm_to_vmem [thread:$0]  %s2751_s2, 80, %s42_s27, [#allocation6]  }
  0x26   :  { %2089 = dma.done.wait [#allocation3], 8192  }
  0x27   :  { %2090 = vsyncadd [#allocation3], 4294959104 }
  0x28   :  { %2091 = dma.done.wait [#allocation6], 10320  }
  0x29   :  { %2092 = vsyncadd [#allocation6], 4294956976  ;;  %v1897_v0 = vld [vmem:[#allocation5 + $0x11c] ss:$20 sps:$4 sm:$0xff]   ;;  %v1899_v1 = vld [vmem:[#allocation5 + $0x124] ss:$20 sps:$4 sm:$0xff]  }
  0x2a   :  { %898 = vmatprep.subr.bf16.mxu0 %v1897_v0  ;;  %v1901_v2 = vld [vmem:[#allocation5 + $0x118] ss:$20 sps:$4 sm:$0xff]   ;;  %v1902_v3 = vld [vmem:[#allocation5 + $0x120] ss:$20 sps:$4 sm:$0xff]   ;;  %1011 = vmatprep.subr.bf16.mxu1 %v1899_v1  ;;  %v1905_v5 = vld [vmem:[#allocation5 + $0xfc] ss:$20 sps:$4 sm:$0xff]  }
  0x2b   :  { %v1903_v4 = vld [vmem:[#allocation5 + $0xf4] ss:$20 sps:$4 sm:$0xff]   ;;  %899 = vmatpush1.bf16.msra.mxu0 %v1901_v2  ;;  %1012 = vmatpush1.bf16.msra.mxu1 %v1902_v3  ;;  %v1907_v6 = vld [vmem:[#allocation5 + $0xf0] ss:$20 sps:$4 sm:$0xff]   ;;  %v1908_v7 = vld [vmem:[#allocation5 + $0xf8] ss:$20 sps:$4 sm:$0xff]  }
  0x2c   :  { %900 = vmatprep.subr.bf16.mxu0 %v1903_v4  ;;  %1013 = vmatprep.subr.bf16.mxu1 %v1905_v5  ;;  %v1909_v8 = vld [vmem:[#allocation5 + $0xcc] ss:$20 sps:$4 sm:$0xff]   ;;  %v1911_v9 = vld [vmem:[#allocation5 + $0xd4] ss:$20 sps:$4 sm:$0xff]   ;;  %v1914_v11 = vld [vmem:[#allocation5 + $0xd0] ss:$20 sps:$4 sm:$0xff]  }
  0x2d   :  { %v1913_v10 = vld [vmem:[#allocation5 + $0xc8] ss:$20 sps:$4 sm:$0xff]   ;;  %v1915_v12 = vld [vmem:[#allocation5 + $0xa4] ss:$20 sps:$4 sm:$0xff]   ;;  %v1917_v13 = vld [vmem:[#allocation5 + $0xac] ss:$20 sps:$4 sm:$0xff]  }
  0x2e   :  { %v1919_v14 = vld [vmem:[#allocation5 + $0xa0] ss:$20 sps:$4 sm:$0xff]   ;;  %v1920_v15 = vld [vmem:[#allocation5 + $0xa8] ss:$20 sps:$4 sm:$0xff]   ;;  %v1923_v17 = vld [vmem:[#allocation5 + $0x84] ss:$20 sps:$4 sm:$0xff]  }
  0x2f   :  { %901 = vmatpush1.bf16.msra.mxu0 %v1907_v6  ;;  %1014 = vmatpush1.bf16.msra.mxu1 %v1908_v7  ;;  %v1921_v16 = vld [vmem:[#allocation5 + $0x7c] ss:$20 sps:$4 sm:$0xff]   ;;  %v1925_v18 = vld [vmem:[#allocation5 + $0x78] ss:$20 sps:$4 sm:$0xff]   ;;  %v1926_v19 = vld [vmem:[#allocation5 + $0x80] ss:$20 sps:$4 sm:$0xff]  }
  0x30   :  { %902 = vmatprep.subr.bf16.mxu0 %v1909_v8  ;;  %1015 = vmatprep.subr.bf16.mxu1 %v1911_v9  ;;  %v1927_v20 = vld [vmem:[#allocation5 + $0x54] ss:$20 sps:$4 sm:$0xff]   ;;  %v1929_v21 = vld [vmem:[#allocation5 + $0x5c] ss:$20 sps:$4 sm:$0xff]   ;;  %v1932_v23 = vld [vmem:[#allocation5 + $0x58] ss:$20 sps:$4 sm:$0xff]  }
  0x31   :  { %v1931_v22 = vld [vmem:[#allocation5 + $0x50] ss:$20 sps:$4 sm:$0xff]   ;;  %v1933_v24 = vld [vmem:[#allocation5 + $0x2c] ss:$20 sps:$4 sm:$0xff]   ;;  %v1935_v25 = vld [vmem:[#allocation5 + $0x34] ss:$20 sps:$4 sm:$0xff]  }
  0x32   :  { %v1937_v26 = vld [vmem:[#allocation5 + $0x28] ss:$20 sps:$4 sm:$0xff]   ;;  %v1938_v27 = vld [vmem:[#allocation5 + $0x30] ss:$20 sps:$4 sm:$0xff]   ;;  %v1941_v29 = vld [vmem:[#allocation5 + $0xc] ss:$20 sps:$4 sm:$0xff]  }
  0x33   :  { %903 = vmatpush1.bf16.msra.mxu0 %v1913_v10  ;;  %1016 = vmatpush1.bf16.msra.mxu1 %v1914_v11  ;;  %v1939_v28 = vld [vmem:[#allocation5 + $0x4] ss:$20 sps:$4 sm:$0xff]   ;;  %v1943_v30 = vld [vmem:[#allocation5] ss:$20 sps:$4 sm:$0xff]   ;;  %v1944_v31 = vld [vmem:[#allocation5 + $0x8] ss:$20 sps:$4 sm:$0xff]  }
  0x34   :  { %904 = vmatprep.subr.bf16.mxu0 %v1915_v12  ;;  %1017 = vmatprep.subr.bf16.mxu1 %v1917_v13  ;;  %v1945_v32 = vld [vmem:[#allocation5 + $0x25c] ss:$20 sps:$4 sm:$0xff]   ;;  %v1947_v33 = vld [vmem:[#allocation5 + $0x264] ss:$20 sps:$4 sm:$0xff]   ;;  %v1950_v35 = vld [vmem:[#allocation5 + $0x260] ss:$20 sps:$4 sm:$0xff]  }
  0x35   :  { %v1949_v34 = vld [vmem:[#allocation5 + $0x258] ss:$20 sps:$4 sm:$0xff]   ;;  %v1951_v36 = vld [vmem:[#allocation5 + $0x234] ss:$20 sps:$4 sm:$0xff]   ;;  %v1953_v37 = vld [vmem:[#allocation5 + $0x23c] ss:$20 sps:$4 sm:$0xff]  }
  0x36   :  { %v1955_v38 = vld [vmem:[#allocation5 + $0x230] ss:$20 sps:$4 sm:$0xff]   ;;  %v1956_v39 = vld [vmem:[#allocation5 + $0x238] ss:$20 sps:$4 sm:$0xff]   ;;  %v1959_v41 = vld [vmem:[#allocation5 + $0x214] ss:$20 sps:$4 sm:$0xff]  }
  0x37   :  { %905 = vmatpush1.bf16.msra.mxu0 %v1919_v14  ;;  %1018 = vmatpush1.bf16.msra.mxu1 %v1920_v15  ;;  %v1957_v40 = vld [vmem:[#allocation5 + $0x20c] ss:$20 sps:$4 sm:$0xff]   ;;  %v1961_v42 = vld [vmem:[#allocation5 + $0x208] ss:$20 sps:$4 sm:$0xff]   ;;  %v1962_v43 = vld [vmem:[#allocation5 + $0x210] ss:$20 sps:$4 sm:$0xff]  }
  0x38   :  { %906 = vmatprep.subr.bf16.mxu0 %v1921_v16  ;;  %1019 = vmatprep.subr.bf16.mxu1 %v1923_v17  ;;  %v1963_v44 = vld [vmem:[#allocation5 + $0x1e4] ss:$20 sps:$4 sm:$0xff]   ;;  %v1965_v45 = vld [vmem:[#allocation5 + $0x1ec] ss:$20 sps:$4 sm:$0xff]   ;;  %v1968_v47 = vld [vmem:[#allocation5 + $0x1e8] ss:$20 sps:$4 sm:$0xff]  }
  0x39   :  { %v1967_v46 = vld [vmem:[#allocation5 + $0x1e0] ss:$20 sps:$4 sm:$0xff]   ;;  %v1969_v49 = vld [vmem:[#allocation5 + $0x1bc] ss:$20 sps:$4 sm:$0xff]   ;;  %v1971_v50 = vld [vmem:[#allocation5 + $0x1c4] ss:$20 sps:$4 sm:$0xff]  }
  0x3a   :  { %v55_v48 = vld [vmem:[#allocation2] sm:$0xff]  ;;  %v56_v51 = vld [vmem:[#allocation2 + $0x8] sm:$0xff]  ;;  %v57_v52 = vld [vmem:[#allocation2 + $0x10] sm:$0xff]  ;;  %vm1661_vm0 = vcmask 1041409   ;;  %vm1663_vm1 = vcmask 1042434   ;;  %vm1665_vm2 = vcmask 1043459  }
  0x3b   :  { %907 = vmatpush1.bf16.msra.mxu0 %v1925_v18  ;;  %1020 = vmatpush1.bf16.msra.mxu1 %v1926_v19  ;;  %v58_v53 = vld [vmem:[#allocation2 + $0x18] sm:$0xff]  ;;  %v120_v54 = vunpack.c.h.bf16 %v55_v48  ;;  %v119_v55 = vunpack.c.l.bf16 %v55_v48  ;;  %v59_v56 = vld [vmem:[#allocation2 + $0x20] sm:$0xff]  ;;  %v60_v57 = vld [vmem:[#allocation2 + $0x28] sm:$0xff]  ;;  %v122_v59 = vunpack.c.h.bf16 %v56_v51  ;;  %v124_v60 = vunpack.c.h.bf16 %v57_v52  ;;  %s2102_s0 = smov [#allocation8]  }
  0x3c   :  { %908 = vmatprep.subr.bf16.mxu0 %v1927_v20  ;;  %1021 = vmatprep.subr.bf16.mxu1 %v1929_v21  ;;  %v2132_v58 = vld [vmem:[#allocation2 + $0x30] sm:$0xff]  ;;  %v126_v61 = vunpack.c.h.bf16 %v58_v53  ;;  %v121_v62 = vunpack.c.l.bf16 %v56_v51  ;;  %v2134_v63 = vld [vmem:[#allocation2 + $0x38] sm:$0xff]  ;;  %v128_v0 = vunpack.c.h.bf16 %v59_v56  ;;  %v130_v1 = vunpack.c.h.bf16 %v60_v57  ;;  %v2138_v12 = vld [vmem:[#allocation2 + $0x40] sm:$0xff]  ;;  %s1719_s2 = sshll.u32 %s2102_s0, 4  ;;  %s1720_s2 = int_to_ptr.vmem [resolvable:$true] %s1719_s2 }
  0x3d   :  { %v132_v2 = vunpack.c.h.bf16 %v2132_v58  ;;  %v123_v3 = vunpack.c.l.bf16 %v57_v52  ;;  %v1973_v4 = vld [vmem:[#allocation5 + $0x1b8] ss:$20 sps:$4 sm:$0xff]   ;;  %v134_v5 = vunpack.c.h.bf16 %v2134_v63  ;;  %v250_v6 = vadd.f32 %v124_v60, %v120_v54  ;;  %v1974_v9 = vld [vmem:[#allocation5 + $0x1c0] ss:$20 sps:$4 sm:$0xff]   ;;  %v1985_v51 = vld [vmem:[#allocation5 + $0x168] ss:$20 sps:$4 sm:$0xff]   ;;  %p2074_p2 = scmp.lt.s32.totalorder %s1720_s2, %s1720_s2 }
  0x3e   :  { %v256_v7 = vadd.f32 %v126_v61, %v122_v59  ;;  %v125_v8 = vunpack.c.l.bf16 %v58_v53  ;;  %v127_v10 = vunpack.c.l.bf16 %v59_v56  ;;  %v129_v11 = vunpack.c.l.bf16 %v60_v57  ;;  %v2140_v13 = vld [vmem:[#allocation2 + $0x48] sm:$0xff]  ;;  %v65_v17 = vld [vmem:[#allocation2 + $0x50] sm:$0xff]  ;;  %v66_v18 = vld [vmem:[#allocation2 + $0x58] sm:$0xff]  ;;  %s2069_s4 = scalar_lea.vmem %s1720_s2, 640 }
  0x3f   :  { %909 = vmatpush1.bf16.msra.mxu0 %v1931_v22  ;;  %1022 = vmatpush1.bf16.msra.mxu1 %v1932_v23  ;;  %v251_v14 = vadd.f32 %v250_v6, %v128_v0  ;;  %v247_v16 = vadd.f32 %v123_v3, %v119_v55  ;;  %v2142_v19 = vld [vmem:[#allocation2 + $0x60] sm:$0xff]  ;;  %v136_v20 = vunpack.c.h.bf16 %v2138_v12  ;;  %v1975_v21 = vld [vmem:[#allocation5 + $0x194] ss:$20 sps:$4 sm:$0xff]   ;;  %v1977_v22 = vld [vmem:[#allocation5 + $0x19c] ss:$20 sps:$4 sm:$0xff]   ;;  %v141_v55 = vunpack.c.l.bf16 %v66_v18  ;;  %p2070_p1 = scmp.ne.s32.totalorder %s1720_s2, %s2069_s4  ;;  %p2075_p3 = scmp.lt.s32.totalorder %s2069_s4, %s2069_s4 }
  0x40   :  { %910 = vmatprep.subr.bf16.mxu0 %v1933_v24  ;;  %1023 = vmatprep.subr.bf16.mxu1 %v1935_v25  ;;  %v257_v15 = vadd.f32 %v256_v7, %v130_v1  ;;  %v253_v23 = vadd.f32 %v125_v8, %v121_v62  ;;  %v2145_v24 = vld [vmem:[#allocation2 + $0x68] sm:$0xff]  ;;  %v138_v25 = vunpack.c.h.bf16 %v2140_v13  ;;  %v2160_v48 = vld [vmem:[#allocation2 + $0x80] sm:$0xff]  ;;  %v2170_v56 = vld [vmem:[#allocation2 + $0x98] sm:$0xff]  ;;  %v143_v60 = vunpack.c.l.bf16 %v2142_v19 }
  0x41   :  { %v2172_v57 = vld [vmem:[#allocation2 + $0xa0] sm:$0xff]  ;;  %v145_v61 = vunpack.c.l.bf16 %v2145_v24  ;;  %v2176_v62 = vld [vmem:[#allocation2 + $0xa8] sm:$0xff]  ;;  %v2180_v7 = vld [vmem:[#allocation2 + $0xb0] sm:$0xff]  ;;  %vm1667_vm3 = vcmask 1044484   ;;  %vm1669_vm4 = vcmask 1045509   ;;  %vm1671_vm5 = vcmask 1046534   ;;  %p2076_p4 = por %p2075_p3, %p2074_p2 }
  0x42   :  { %v1987_v0 = vld [vmem:[#allocation5 + $0x144] ss:$20 sps:$4 sm:$0xff]   ;;  %vm1673_vm6 = vcmask 1047559  }
  0x43   :  { %911 = vmatpush1.bf16.msra.mxu0 %v1937_v26  ;;  %1024 = vmatpush1.bf16.msra.mxu1 %v1938_v27  ;;  %v140_v26 = vunpack.c.h.bf16 %v65_v17  ;;  %v142_v27 = vunpack.c.h.bf16 %v66_v18  ;;  %v2182_v8 = vld [vmem:[#allocation2 + $0xb8] sm:$0xff]  ;;  %p2077_p5 = pnand %p2076_p4, %p2070_p1 }
  0x44   :  { %912 = vmatprep.subr.bf16.mxu0 %v1939_v28  ;;  %1025 = vmatprep.subr.bf16.mxu1 %v1941_v29  ;;  %v1979_v28 = vld [vmem:[#allocation5 + $0x190] ss:$20 sps:$4 sm:$0xff]   ;;  %v252_v29 = vadd.f32 %v251_v14, %v132_v2  ;;  %v160_v14 = vunpack.c.h.bf16 %v2172_v57 }
  0x47   :  { %913 = vmatpush1.bf16.msra.mxu0 %v1943_v30  ;;  %1026 = vmatpush1.bf16.msra.mxu1 %v1944_v31  ;;  %v258_v30 = vadd.f32 %v257_v15, %v134_v5  ;;  %v2148_v31 = vld [vmem:[#allocation2 + $0x70] sm:$0xff]  ;;  %v1989_v5 = vld [vmem:[#allocation5 + $0x14c] ss:$20 sps:$4 sm:$0xff]   ;;  %v162_v15 = vunpack.c.h.bf16 %v2176_v62 }
  0x48   :  { %914 = vmatprep.subr.bf16.mxu0 %v1945_v32  ;;  %1027 = vmatprep.subr.bf16.mxu1 %v1947_v33  ;;  %v144_v32 = vunpack.c.h.bf16 %v2142_v19  ;;  %v131_v33 = vunpack.c.l.bf16 %v2132_v58  ;;  %v148_v52 = vunpack.c.h.bf16 %v2148_v31  ;;  %v147_v6 = vunpack.c.l.bf16 %v2148_v31  ;;  %v2196_v31 = vld [vmem:[#allocation2 + $0xc0] sm:$0xff] }
  0x4b   :  { %915 = vmatpush2.bf16.msra.mxu0 %v1949_v34  ;;  %1028 = vmatpush2.bf16.msra.mxu1 %v1950_v35  ;;  %v133_v34 = vunpack.c.l.bf16 %v2134_v63  ;;  %v248_v35 = vadd.f32 %v247_v16, %v127_v10  ;;  %v1986_v63 = vld [vmem:[#allocation5 + $0x170] ss:$20 sps:$4 sm:$0xff]   ;;  %v1991_v16 = vld [vmem:[#allocation5 + $0x140] ss:$20 sps:$4 sm:$0xff]  }
  0x4c   :  { %916 = vmatprep.subr.bf16.mxu0 %v1951_v36  ;;  %1029 = vmatprep.subr.bf16.mxu1 %v1953_v37  ;;  %v2153_v36 = vld [vmem:[#allocation2 + $0x78] sm:$0xff]  ;;  %v146_v37 = vunpack.c.h.bf16 %v2145_v24 }
  0x4d   :  { %v150_v53 = vunpack.c.h.bf16 %v2153_v36  ;;  %v249_v58 = vadd.f32 %v248_v35, %v131_v33 }
  0x4f   :  { %917 = vmatpush2.bf16.msra.mxu0 %v1955_v38  ;;  %1030 = vmatpush2.bf16.msra.mxu1 %v1956_v39  ;;  %v1980_v38 = vld [vmem:[#allocation5 + $0x198] ss:$20 sps:$4 sm:$0xff]  }
  0x50   :  { %918 = vmatprep.subr.bf16.mxu0 %v1957_v40  ;;  %1031 = vmatprep.subr.bf16.mxu1 %v1959_v41  ;;  %v1981_v39 = vld [vmem:[#allocation5 + $0x16c] ss:$20 sps:$4 sm:$0xff]   ;;  %v1983_v40 = vld [vmem:[#allocation5 + $0x174] ss:$20 sps:$4 sm:$0xff]   ;;  %v2156_v41 = vpack.c.bf16 %v258_v30, %v252_v29  ;;  %v157_v30 = vunpack.c.l.bf16 %v2170_v56 }
  0x52   :  { %930 = vmatprep.mubr.bf16.mxu0 %v2156_v41  ;;  %1043 = vmatprep.mubr.bf16.mxu1 %v2156_v41 }
  0x53   :  { %919 = vmatpush2.bf16.msra.mxu0 %v1961_v42  ;;  %1032 = vmatpush2.bf16.msra.mxu1 %v1962_v43  ;;  %v254_v42 = vadd.f32 %v253_v23, %v129_v11  ;;  %v262_v43 = vadd.f32 %v140_v26, %v136_v20  ;;  %v158_v11 = vunpack.c.h.bf16 %v2170_v56  ;;  %v166_v23 = vunpack.c.h.bf16 %v2182_v8  ;;  %v1993_v26 = vld [vmem:[#allocation5 + $0x268] ss:$20 sps:$4 sm:$0xff]  }
  0x54   :  { %920 = vmatprep.subr.bf16.mxu0 %v1963_v44  ;;  %1033 = vmatprep.subr.bf16.mxu1 %v1965_v45  ;;  %v135_v44 = vunpack.c.l.bf16 %v2138_v12  ;;  %v268_v45 = vadd.f32 %v142_v27, %v138_v25  ;;  %v151_v25 = vunpack.c.l.bf16 %v2160_v48 }
  0x55   :  { %v263_v54 = vadd.f32 %v262_v43, %v144_v32  ;;  %v255_v1 = vadd.f32 %v254_v42, %v133_v34  ;;  %v2198_v32 = vld [vmem:[#allocation2 + $0xc8] sm:$0xff]  ;;  %v161_v42 = vunpack.c.l.bf16 %v2176_v62  ;;  %v2206_v43 = vld [vmem:[#allocation2 + $0xe0] sm:$0xff]  ;;  %v2221_v62 = vld [vmem:[#allocation2 + $0xf8] sm:$0xff] }
  0x56   :  { %v269_v59 = vadd.f32 %v268_v45, %v146_v37  ;;  %v82_v37 = vld [vmem:[#allocation2 + $0xd8] sm:$0xff]  ;;  %v176_v56 = vunpack.c.h.bf16 %v2206_v43 }
  0x57   :  { %921 = vmatpush2.bf16.msra.mxu0 %v1967_v46  ;;  %1034 = vmatpush2.bf16.msra.mxu1 %v1968_v47  ;;  %v137_v46 = vunpack.c.l.bf16 %v2140_v13  ;;  %v139_v47 = vunpack.c.l.bf16 %v65_v17  ;;  %v264_v12 = vadd.f32 %v263_v54, %v148_v52  ;;  %v149_v17 = vunpack.c.l.bf16 %v2153_v36  ;;  %v81_v36 = vld [vmem:[#allocation2 + $0xd0] sm:$0xff]  ;;  %v1994_v45 = vld [vmem:[#allocation5 + $0x128] ss:$20 sps:$4 sm:$0xff]  }
  0x58   :  { %922 = vmatprep.subr.bf16.mxu0 %v1969_v49  ;;  %1035 = vmatprep.subr.bf16.mxu1 %v1971_v50  ;;  %v2162_v49 = vld [vmem:[#allocation2 + $0x88] sm:$0xff]  ;;  %v2164_v50 = vld [vmem:[#allocation2 + $0x90] sm:$0xff]  ;;  %v270_v13 = vadd.f32 %v269_v59, %v150_v53  ;;  %v2200_v33 = vpack.c.bf16 %v255_v1, %v249_v58  ;;  %v172_v52 = vunpack.c.h.bf16 %v81_v36  ;;  %v174_v53 = vunpack.c.h.bf16 %v82_v37  ;;  %v2223_v1 = vld [vmem:[#allocation2 + $0x100] sm:$0xff] }
  0x59   :  { %v259_v2 = vadd.f32 %v139_v47, %v135_v44  ;;  %v265_v3 = vadd.f32 %v141_v55, %v137_v46  ;;  %v156_v10 = vunpack.c.h.bf16 %v2164_v50  ;;  %v155_v29 = vunpack.c.l.bf16 %v2164_v50  ;;  %v2208_v44 = vld [vmem:[#allocation2 + $0xe8] sm:$0xff]  ;;  %v1995_v54 = vld [vmem:[#allocation5 + $0x240] ss:$20 sps:$4 sm:$0xff]  }
  0x5a   :  { %v2202_v34 = vpack.c.bf16 %v270_v13, %v264_v12  ;;  %v1996_v55 = vld [vmem:[#allocation5 + $0x100] ss:$20 sps:$4 sm:$0xff]   ;;  %v163_v59 = vunpack.c.l.bf16 %v2180_v7  ;;  %v173_v12 = vunpack.c.l.bf16 %v82_v37  ;;  %v2236_v13 = vld [vmem:[#allocation2 + $0x118] sm:$0xff] }
  0x5b   :  { %923 = vmatpush2.bf16.msra.mxu0 %v1973_v4  ;;  %1036 = vmatpush2.bf16.msra.mxu1 %v1974_v9  ;;  %v152_v4 = vunpack.c.h.bf16 %v2160_v48  ;;  %v154_v9 = vunpack.c.h.bf16 %v2162_v49  ;;  %v260_v18 = vadd.f32 %v259_v2, %v143_v60  ;;  %v266_v19 = vadd.f32 %v265_v3, %v145_v61  ;;  %v1997_v60 = vld [vmem:[#allocation5 + $0x218] ss:$20 sps:$4 sm:$0xff]   ;;  %v2219_v61 = vld [vmem:[#allocation2 + $0xf0] sm:$0xff] }
  0x5c   :  { %924 = vmatprep.subr.bf16.mxu0 %v1975_v21  ;;  %1037 = vmatprep.subr.bf16.mxu1 %v1977_v22  ;;  %v1992_v21 = vld [vmem:[#allocation5 + $0x148] ss:$20 sps:$4 sm:$0xff]   ;;  %v164_v22 = vunpack.c.h.bf16 %v2180_v7  ;;  %v271_v47 = vadd.f32 %v155_v29, %v151_v25  ;;  %v168_v48 = vunpack.c.h.bf16 %v2196_v31  ;;  %v165_v2 = vunpack.c.l.bf16 %v2182_v8  ;;  %v2230_v7 = vld [vmem:[#allocation2 + $0x110] sm:$0xff] }
  0x5d   :  { %v274_v20 = vadd.f32 %v156_v10, %v152_v4  ;;  %v280_v24 = vadd.f32 %v158_v11, %v154_v9  ;;  %v167_v3 = vunpack.c.l.bf16 %v2196_v31  ;;  %v169_v4 = vunpack.c.l.bf16 %v2198_v32 }
  0x5e   :  { %v180_v8 = vunpack.c.h.bf16 %v2219_v61  ;;  %v184_v25 = vunpack.c.h.bf16 %v2223_v1  ;;  %v179_v31 = vunpack.c.l.bf16 %v2219_v61 }
  0x5f   :  { %925 = vmatpush2.bf16.msra.mxu0 %v1979_v28  ;;  %1038 = vmatpush2.bf16.msra.mxu1 %v1980_v38  ;;  %v275_v27 = vadd.f32 %v274_v20, %v160_v14  ;;  %v153_v28 = vunpack.c.l.bf16 %v2162_v49  ;;  %v281_v35 = vadd.f32 %v280_v24, %v162_v15  ;;  %v261_v38 = vadd.f32 %v260_v18, %v147_v6  ;;  %v2228_v6 = vld [vmem:[#allocation2 + $0x108] sm:$0xff]  ;;  %v2246_v24 = vld [vmem:[#allocation2 + $0x130] sm:$0xff] }
  0x60   :  { %926 = vmatprep.subr.bf16.mxu0 %v1981_v39  ;;  %1039 = vmatprep.subr.bf16.mxu1 %v1983_v40  ;;  %v267_v39 = vadd.f32 %v266_v19, %v149_v17  ;;  %v159_v40 = vunpack.c.l.bf16 %v2172_v57  ;;  %v170_v49 = vunpack.c.h.bf16 %v2198_v32  ;;  %v178_v57 = vunpack.c.h.bf16 %v2208_v44  ;;  %v2240_v17 = vld [vmem:[#allocation2 + $0x120] sm:$0xff]  ;;  %v2253_v32 = vld [vmem:[#allocation2 + $0x138] sm:$0xff] }
  0x61   :  { %v276_v46 = vadd.f32 %v275_v27, %v164_v22  ;;  %v282_v50 = vadd.f32 %v281_v35, %v166_v23  ;;  %v182_v14 = vunpack.c.h.bf16 %v2221_v62  ;;  %v175_v18 = vunpack.c.l.bf16 %v2206_v43  ;;  %v2244_v22 = vld [vmem:[#allocation2 + $0x128] sm:$0xff] }
  0x62   :  { %v2216_v58 = vpack.c.bf16 %v267_v39, %v261_v38  ;;  %v272_v10 = vadd.f32 %v271_v47, %v159_v40  ;;  %v177_v19 = vunpack.c.l.bf16 %v2208_v44  ;;  %v1998_v23 = vld [vmem:[#allocation5 + $0xd8] ss:$20 sps:$4 sm:$0xff]   ;;  %v188_v27 = vunpack.c.h.bf16 %v2230_v7  ;;  %v1999_v38 = vld [vmem:[#allocation5 + $0x1f0] ss:$20 sps:$4 sm:$0xff]  }
  0x63   :  { %927 = vmatpush2.bf16.msra.mxu0 %v1985_v51  ;;  %1040 = vmatpush2.bf16.msra.mxu1 %v1986_v63  ;;  %v277_v51 = vadd.f32 %v157_v30, %v153_v28  ;;  %v286_v63 = vadd.f32 %v172_v52, %v168_v48  ;;  %v2234_v9 = vpack.c.bf16 %v282_v50, %v276_v46  ;;  %v190_v28 = vunpack.c.h.bf16 %v2236_v13  ;;  %v2000_v46 = vld [vmem:[#allocation5 + $0xb0] ss:$20 sps:$4 sm:$0xff]   ;;  %v2267_v52 = vld [vmem:[#allocation2 + $0x148] sm:$0xff] }
  0x64   :  { %928 = vmatprep.subr.bf16.mxu0 %v1987_v0  ;;  %1041 = vmatprep.subr.bf16.mxu1 %v1989_v5  ;;  %v292_v0 = vadd.f32 %v174_v53, %v170_v49  ;;  %v171_v5 = vunpack.c.l.bf16 %v81_v36  ;;  %v273_v29 = vadd.f32 %v272_v10, %v163_v59  ;;  %v192_v35 = vunpack.c.h.bf16 %v2240_v17  ;;  %v2272_v59 = vld [vmem:[#allocation2 + $0x150] sm:$0xff] }
  0x65   :  { %v278_v11 = vadd.f32 %v277_v51, %v161_v42  ;;  %v287_v15 = vadd.f32 %v286_v63, %v176_v56  ;;  %v194_v39 = vunpack.c.h.bf16 %v2244_v22  ;;  %v298_v40 = vadd.f32 %v188_v27, %v184_v25  ;;  %v2265_v51 = vld [vmem:[#allocation2 + $0x140] sm:$0xff] }
  0x66   :  { %v283_v20 = vadd.f32 %v171_v5, %v167_v3  ;;  %v181_v42 = vunpack.c.l.bf16 %v2221_v62  ;;  %v196_v47 = vunpack.c.h.bf16 %v2246_v24  ;;  %v198_v48 = vunpack.c.h.bf16 %v2253_v32  ;;  %v2280_v63 = vld [vmem:[#allocation2 + $0x160] sm:$0xff] }
  0x67   :  { %929 = vmatpush2.bf16.msra.mxu0 %v1991_v16  ;;  %1042 = vmatpush2.bf16.msra.mxu1 %v1992_v21  ;;  %v293_v16 = vadd.f32 %v292_v0, %v178_v57  ;;  %v289_v21 = vadd.f32 %v173_v12, %v169_v4  ;;  %v279_v30 = vadd.f32 %v278_v11, %v165_v2  ;;  %v183_v50 = vunpack.c.l.bf16 %v2223_v1  ;;  %v2001_v57 = vld [vmem:[#allocation5 + $0x1c8] ss:$20 sps:$4 sm:$0xff]   ;;  %v2301_v25 = vld [vmem:[#allocation2 + $0x180] sm:$0xff] }
  0x68   :  { %1809 = vmatprep.subr.bf16.mxu0 %v1993_v26  ;;  %1873 = vmatprep.subr.bf16.mxu1 %v1993_v26  ;;  %v186_v26 = vunpack.c.h.bf16 %v2228_v6  ;;  %v288_v36 = vadd.f32 %v287_v15, %v180_v8  ;;  %v284_v43 = vadd.f32 %v283_v20, %v175_v18  ;;  %v299_v49 = vadd.f32 %v298_v40, %v192_v35  ;;  %v2282_v2 = vld [vmem:[#allocation2 + $0x168] sm:$0xff] }
  0x69   :  { %v294_v37 = vadd.f32 %v293_v16, %v182_v14  ;;  %v290_v44 = vadd.f32 %v289_v21, %v177_v19  ;;  %v189_v56 = vunpack.c.l.bf16 %v2236_v13  ;;  %v2276_v61 = vpack.c.bf16 %v279_v30, %v273_v29  ;;  %v2002_v14 = vld [vmem:[#allocation5 + $0x88] ss:$20 sps:$4 sm:$0xff]   ;;  %v2003_v19 = vld [vmem:[#allocation5 + $0x1a0] ss:$20 sps:$4 sm:$0xff]  }
  0x6a   :  { %931 = vmatmul.mubr.bf16.vlgmr.msra.gmra.mxu0 %v2200_v33  ;;  %1044 = vmatmul.mubr.bf16.vlgmr.msra.gmra.mxu1 %v2200_v33  ;;  %v285_v0 = vadd.f32 %v284_v43, %v179_v31  ;;  %v200_v3 = vunpack.c.h.bf16 %v2265_v51  ;;  %v202_v4 = vunpack.c.h.bf16 %v2267_v52  ;;  %v300_v5 = vadd.f32 %v299_v49, %v196_v47  ;;  %v2309_v30 = vld [vmem:[#allocation2 + $0x188] sm:$0xff]  ;;  %v2313_v31 = vld [vmem:[#allocation2 + $0x198] sm:$0xff] }
  0x6b   :  { %1810 = vmatpush3.bf16.msra.mxu0 %v1994_v45  ;;  %1881 = vmatpush3.bf16.msra.mxu1 %v1994_v45  ;;  %v304_v45 = vadd.f32 %v190_v28, %v186_v26  ;;  %v2278_v62 = vpack.c.bf16 %v294_v37, %v288_v36  ;;  %v291_v1 = vadd.f32 %v290_v44, %v181_v42  ;;  %v193_v12 = vunpack.c.l.bf16 %v2244_v22  ;;  %v2297_v22 = vld [vmem:[#allocation2 + $0x170] sm:$0xff]  ;;  %v2322_v47 = vld [vmem:[#allocation2 + $0x1a8] sm:$0xff] }
  0x6c   :  { %940 = vmatprep.mubr.bf16.mxu0 %v2202_v34  ;;  %1053 = vmatprep.mubr.bf16.mxu1 %v2202_v34  ;;  %v208_v15 = vunpack.c.h.bf16 %v2280_v63  ;;  %v210_v16 = vunpack.c.h.bf16 %v2282_v2  ;;  %v195_v21 = vunpack.c.l.bf16 %v2246_v24  ;;  %v199_v26 = vunpack.c.l.bf16 %v2265_v51  ;;  %v2311_v24 = vld [vmem:[#allocation2 + $0x190] sm:$0xff] }
  0x6d   :  { %1811 = vmatprep.subr.bf16.mxu0 %v1995_v54  ;;  %1874 = vmatprep.subr.bf16.mxu1 %v1995_v54  ;;  %v305_v53 = vadd.f32 %v304_v45, %v194_v39  ;;  %v185_v54 = vunpack.c.l.bf16 %v2228_v6  ;;  %v191_v6 = vunpack.c.l.bf16 %v2240_v17  ;;  %v2294_v20 = vpack.c.bf16 %v291_v1, %v285_v0  ;;  %v2004_v39 = vld [vmem:[#allocation5 + $0x60] ss:$20 sps:$4 sm:$0xff]   ;;  %v2333_v0 = vld [vmem:[#allocation2 + $0x1b8] sm:$0xff] }
  0x6e   :  { %v201_v27 = vunpack.c.l.bf16 %v2267_v52  ;;  %v203_v28 = vunpack.c.l.bf16 %v2272_v59  ;;  %v197_v36 = vunpack.c.l.bf16 %v2253_v32  ;;  %v212_v40 = vunpack.c.h.bf16 %v2297_v22  ;;  %v2320_v45 = vld [vmem:[#allocation2 + $0x1a0] sm:$0xff] }
  0x6f   :  { %1812 = vmatpush3.bf16.msra.mxu0 %v1996_v55  ;;  %1882 = vmatpush3.bf16.msra.mxu1 %v1996_v55  ;;  %v187_v55 = vunpack.c.l.bf16 %v2230_v7  ;;  %v204_v7 = vunpack.c.h.bf16 %v2272_v59  ;;  %v306_v11 = vadd.f32 %v305_v53, %v198_v48  ;;  %v301_v8 = vadd.f32 %v189_v56, %v185_v54 }
  0x70   :  { %1813 = vmatprep.subr.bf16.mxu0 %v1997_v60  ;;  %1875 = vmatprep.subr.bf16.mxu1 %v1997_v60  ;;  %v2274_v60 = vld [vmem:[#allocation2 + $0x158] sm:$0xff]  ;;  %v216_v32 = vunpack.c.h.bf16 %v2301_v25  ;;  %v218_v48 = vunpack.c.h.bf16 %v2309_v30  ;;  %v220_v49 = vunpack.c.h.bf16 %v2311_v24  ;;  %v207_v51 = vunpack.c.l.bf16 %v2280_v63  ;;  %v2007_v63 = vld [vmem:[#allocation5 + $0x150] ss:$20 sps:$4 sm:$0xff]  }
  0x71   :  { %v206_v10 = vunpack.c.h.bf16 %v2274_v60  ;;  %v295_v13 = vadd.f32 %v187_v55, %v183_v50  ;;  %v310_v18 = vadd.f32 %v204_v7, %v200_v3  ;;  %v205_v29 = vunpack.c.l.bf16 %v2274_v60  ;;  %v2331_v60 = vld [vmem:[#allocation2 + $0x1b0] sm:$0xff] }
  0x72   :  { %941 = vmatmul.mubr.bf16.gmra.mxu0 %v2216_v58  ;;  %1054 = vmatmul.mubr.bf16.gmra.mxu1 %v2216_v58  ;;  %v2315_v35 = vpack.c.bf16 %v306_v11, %v300_v5  ;;  %v222_v50 = vunpack.c.h.bf16 %v2313_v31  ;;  %v209_v52 = vunpack.c.l.bf16 %v2282_v2  ;;  %v307_v53 = vadd.f32 %v203_v28, %v199_v26 }
  0x73   :  { %950 = vmatprep.mubr.bf16.mxu0 %v2234_v9  ;;  %1063 = vmatprep.mubr.bf16.mxu1 %v2234_v9  ;;  %v316_v17 = vadd.f32 %v206_v10, %v202_v4  ;;  %v296_v37 = vadd.f32 %v295_v13, %v191_v6  ;;  %v311_v43 = vadd.f32 %v310_v18, %v208_v15  ;;  %v224_v55 = vunpack.c.h.bf16 %v2320_v45  ;;  %v2344_v13 = vld [vmem:[#allocation2 + $0x1c8] sm:$0xff]  ;;  %v113_v18 = vld [vmem:[#allocation2 + $0x1d0] sm:$0xff] }
  0x74   :  { %1814 = vmatpush3.bf16.msra.mxu0 %v1998_v23  ;;  %1883 = vmatpush3.bf16.msra.mxu1 %v1998_v23  ;;  %v2299_v23 = vld [vmem:[#allocation2 + $0x178] sm:$0xff]  ;;  %v313_v54 = vadd.f32 %v205_v29, %v201_v27  ;;  %v322_v56 = vadd.f32 %v220_v49, %v216_v32  ;;  %v226_v1 = vunpack.c.h.bf16 %v2322_v47  ;;  %v328_v3 = vadd.f32 %v222_v50, %v218_v48 }
  0x75   :  { %1815 = vmatprep.subr.bf16.mxu0 %v1999_v38  ;;  %1876 = vmatprep.subr.bf16.mxu1 %v1999_v38  ;;  %v302_v38 = vadd.f32 %v301_v8, %v193_v12  ;;  %v214_v42 = vunpack.c.h.bf16 %v2299_v23  ;;  %v317_v44 = vadd.f32 %v316_v17, %v210_v16  ;;  %v297_v59 = vadd.f32 %v296_v37, %v195_v21  ;;  %v2342_v12 = vld [vmem:[#allocation2 + $0x1c0] sm:$0xff]  ;;  %v114_v17 = vld [vmem:[#allocation2 + $0x1d8] sm:$0xff] }
  0x76   :  { %v312_v4 = vadd.f32 %v311_v43, %v212_v40  ;;  %v211_v6 = vunpack.c.l.bf16 %v2297_v22  ;;  %v213_v7 = vunpack.c.l.bf16 %v2299_v23  ;;  %v308_v10 = vadd.f32 %v307_v53, %v207_v51  ;;  %v115_v40 = vld [vmem:[#allocation2 + $0x1e0] sm:$0xff]  ;;  %v117_v51 = vld [vmem:[#allocation2 + $0x1f0] sm:$0xff] }
  0x77   :  { %v303_v2 = vadd.f32 %v302_v38, %v197_v36  ;;  %v318_v5 = vadd.f32 %v317_v44, %v214_v42  ;;  %v314_v11 = vadd.f32 %v313_v54, %v209_v52  ;;  %v228_v8 = vunpack.c.h.bf16 %v2331_v60  ;;  %v118_v52 = vld [vmem:[#allocation2 + $0x1f8] sm:$0xff] }
  0x78   :  { %1816 = vmatpush3.bf16.msra.mxu0 %v2000_v46  ;;  %1884 = vmatpush3.bf16.msra.mxu1 %v2000_v46  ;;  %v2005_v46 = vld [vmem:[#allocation5 + $0x178] ss:$20 sps:$4 sm:$0xff]   ;;  %v323_v15 = vadd.f32 %v322_v56, %v224_v55  ;;  %v215_v16 = vunpack.c.l.bf16 %v2301_v25  ;;  %v329_v21 = vadd.f32 %v328_v3, %v226_v1  ;;  %v217_v22 = vunpack.c.l.bf16 %v2309_v30 }
  0x79   :  { %1817 = vmatprep.subr.bf16.mxu0 %v2001_v57  ;;  %1877 = vmatprep.subr.bf16.mxu1 %v2001_v57  ;;  %v2006_v57 = vld [vmem:[#allocation5 + $0x38] ss:$20 sps:$4 sm:$0xff]   ;;  %v219_v23 = vunpack.c.l.bf16 %v2311_v24  ;;  %v221_v26 = vunpack.c.l.bf16 %v2313_v31  ;;  %v2352_v27 = vpack.c.bf16 %v303_v2, %v297_v59  ;;  %v2354_v28 = vpack.c.bf16 %v318_v5, %v312_v4 }
  0x7a   :  { %951 = vmatmul.mubr.bf16.gmra.mxu0 %v2276_v61  ;;  %1064 = vmatmul.mubr.bf16.gmra.mxu1 %v2276_v61  ;;  %v232_v25 = vunpack.c.h.bf16 %v2342_v12  ;;  %v234_v29 = vunpack.c.h.bf16 %v2344_v13  ;;  %v236_v36 = vunpack.c.h.bf16 %v113_v18  ;;  %v238_v37 = vunpack.c.h.bf16 %v114_v17  ;;  %v116_v31 = vld [vmem:[#allocation2 + $0x1e8] sm:$0xff] }
  0x7b   :  { %960 = vmatprep.mubr.bf16.mxu0 %v2278_v62  ;;  %1073 = vmatprep.mubr.bf16.mxu1 %v2278_v62  ;;  %v309_v38 = vadd.f32 %v308_v10, %v211_v6  ;;  %v223_v30 = vunpack.c.l.bf16 %v2320_v45  ;;  %v225_v24 = vunpack.c.l.bf16 %v2322_v47  ;;  %v324_v42 = vadd.f32 %v323_v15, %v228_v8 }
  0x7c   :  { %1818 = vmatpush3.bf16.msra.mxu0 %v2002_v14  ;;  %1885 = vmatpush3.bf16.msra.mxu1 %v2002_v14  ;;  %v230_v14 = vunpack.c.h.bf16 %v2333_v0  ;;  %v319_v44 = vadd.f32 %v219_v23, %v215_v16  ;;  %v240_v32 = vunpack.c.h.bf16 %v115_v40  ;;  %v242_v45 = vunpack.c.h.bf16 %v116_v31 }
  0x7d   :  { %1819 = vmatprep.subr.bf16.mxu0 %v2003_v19  ;;  %1878 = vmatprep.subr.bf16.mxu1 %v2003_v19  ;;  %v2008_v19 = vld [vmem:[#allocation5 + $0x10] ss:$20 sps:$4 sm:$0xff]   ;;  %v334_v48 = vadd.f32 %v236_v36, %v232_v25  ;;  %v340_v47 = vadd.f32 %v238_v37, %v234_v29  ;;  %v227_v50 = vunpack.c.l.bf16 %v2331_v60  ;;  %v229_v54 = vunpack.c.l.bf16 %v2333_v0 }
  0x7e   :  { %v330_v43 = vadd.f32 %v329_v21, %v230_v14  ;;  %v320_v55 = vadd.f32 %v319_v44, %v223_v30  ;;  %v233_v59 = vunpack.c.l.bf16 %v2344_v13  ;;  %v235_v1 = vunpack.c.l.bf16 %v113_v18 }
  0x7f   :  { %v237_v3 = vunpack.c.l.bf16 %v114_v17  ;;  %v246_v2 = vunpack.c.h.bf16 %v118_v52  ;;  %v335_v4 = vadd.f32 %v334_v48, %v240_v32  ;;  %v341_v5 = vadd.f32 %v340_v47, %v242_v45 }
  0x80   :  { %1820 = vmatpush3.bf16.msra.mxu0 %v2004_v39  ;;  %1886 = vmatpush3.bf16.msra.mxu1 %v2004_v39  ;;  %v315_v39 = vadd.f32 %v314_v11, %v213_v7  ;;  %v356_v53 = vpack.c.bf16 %v330_v43, %v324_v42  ;;  %v321_v6 = vadd.f32 %v320_v55, %v227_v50  ;;  %v239_v60 = vunpack.c.l.bf16 %v115_v40 }
  0x81   :  { %1821 = vmatprep.subr.bf16.mxu0 %v2005_v46  ;;  %1879 = vmatprep.subr.bf16.mxu1 %v2005_v46  ;;  %v325_v46 = vadd.f32 %v221_v26, %v217_v22  ;;  %v241_v10 = vunpack.c.l.bf16 %v116_v31  ;;  %v337_v0 = vadd.f32 %v237_v3, %v233_v59  ;;  %v243_v13 = vunpack.c.l.bf16 %v117_v51 }
  0x82   :  { %961 = vmatmul.mubr.bf16.gmra.mxu0 %v2294_v20  ;;  %1074 = vmatmul.mubr.bf16.gmra.mxu1 %v2294_v20  ;;  %v353_v49 = vpack.c.bf16 %v315_v39, %v309_v38  ;;  %v245_v15 = vunpack.c.l.bf16 %v118_v52 }
  0x83   :  { %970 = vmatprep.mubr.bf16.mxu0 %v2315_v35  ;;  %1083 = vmatprep.mubr.bf16.mxu1 %v2315_v35  ;;  %v326_v56 = vadd.f32 %v325_v46, %v225_v24  ;;  %v338_v18 = vadd.f32 %v337_v0, %v241_v10 }
  0x84   :  { %1822 = vmatpush3.bf16.msra.mxu0 %v2006_v57  ;;  %1887 = vmatpush3.bf16.msra.mxu1 %v2006_v57  ;;  %v231_v57 = vunpack.c.l.bf16 %v2342_v12  ;;  %v342_v12 = vadd.f32 %v341_v5, %v246_v2 }
  0x85   :  { %1823 = vmatprep.subr.bf16.mxu0 %v2007_v63  ;;  %1880 = vmatprep.subr.bf16.mxu1 %v2007_v63  ;;  %v244_v63 = vunpack.c.h.bf16 %v117_v51  ;;  %v327_v7 = vadd.f32 %v326_v56, %v229_v54  ;;  %v339_v21 = vadd.f32 %v338_v18, %v245_v15 }
  0x86   :  { %v331_v11 = vadd.f32 %v235_v1, %v231_v57 }
  0x87   :  { %v336_v8 = vadd.f32 %v335_v4, %v244_v63  ;;  %v355_v14 = vpack.c.bf16 %v327_v7, %v321_v6 }
  0x88   :  { %1824 = vmatpush3.bf16.msra.mxu0 %v2008_v19  ;;  %1888 = vmatpush3.bf16.msra.mxu1 %v2008_v19  ;;  %v332_v16 = vadd.f32 %v331_v11, %v239_v60 }
  0x89   :  { %v358_v17 = vpack.c.bf16 %v342_v12, %v336_v8 }
  0x8a   :  { %971 = vmatmul.mubr.bf16.gmra.mxu0 %v2352_v27  ;;  %1084 = vmatmul.mubr.bf16.gmra.mxu1 %v2352_v27  ;;  %v333_v19 = vadd.f32 %v332_v16, %v243_v13 }
  0x8b   :  { %980 = vmatprep.mubr.bf16.mxu0 %v2354_v28  ;;  %1093 = vmatprep.mubr.bf16.mxu1 %v2354_v28 }
  0x8c   :  { %v357_v22 = vpack.c.bf16 %v339_v21, %v333_v19 }
  0x92   :  { %981 = vmatmul.mubr.bf16.gmra.mxu0 %v353_v49  ;;  %1094 = vmatmul.mubr.bf16.gmra.mxu1 %v353_v49 }
  0x93   :  { %990 = vmatprep.mubr.bf16.mxu0 %v356_v53  ;;  %1103 = vmatprep.mubr.bf16.mxu1 %v356_v53 }
  0x9a   :  { %991 = vmatmul.mubr.bf16.gmra.mxu0 %v355_v14  ;;  %1104 = vmatmul.mubr.bf16.gmra.mxu1 %v355_v14 }
  0x9b   :  { %1000 = vmatprep.mubr.bf16.mxu0 %v358_v17  ;;  %1113 = vmatprep.mubr.bf16.mxu1 %v358_v17 }
  0xa2   :  { %1001 = vmatmul.mubr.bf16.gmra.mxu0 %v357_v22  ;;  %1114 = vmatmul.mubr.bf16.gmra.mxu1 %v357_v22 }
  0xa3   :  { %1156 = vmatprep.mubr.bf16.mxu0 %v2156_v41  ;;  %1188 = vmatprep.mubr.bf16.mxu1 %v2315_v35  ;;  %v457_v41 = vlaneseq  ;;  %v2383_v35 = vld [vmem:[#allocation7] sm:$0x1f] }
  0xaa   :  { %1157 = vmatmul.mubr.bf16.vlgmr.msra.gmra.mxu0 %v2200_v33  ;;  %1189 = vmatmul.mubr.bf16.vlgmr.msra.gmra.mxu1 %v2352_v27  ;;  %v2379_v33 = vshrl.u32 %v457_v41, 7 }
  0xab   :  { %1164 = vmatprep.mubr.bf16.mxu0 %v2202_v34  ;;  %1196 = vmatprep.mubr.bf16.mxu1 %v2354_v28 }
  0xac   :  { %v467_v34 = vsub.s32 2, %v2379_v33 }
  0xae   :  { %v2388_v23 = vrot.slane %v2383_v35, %v467_v34 }
  0xb2   :  { %1165 = vmatmul.mubr.bf16.gmra.mxu0 %v2216_v58  ;;  %1197 = vmatmul.mubr.bf16.gmra.mxu1 %v353_v49  ;;  %v459_v58 = vsub.s32 0, %v2379_v33 }
  0xb3   :  { %1172 = vmatprep.mubr.bf16.mxu0 %v2234_v9  ;;  %1204 = vmatprep.mubr.bf16.mxu1 %v356_v53  ;;  %v463_v9 = vsub.s32 1, %v2379_v33 }
  0xb5   :  { %v2394_v27 = vrot.slane %v2383_v35, %v463_v9 }
  0xba   :  { %1173 = vmatmul.mubr.bf16.gmra.mxu0 %v2276_v61  ;;  %1205 = vmatmul.mubr.bf16.gmra.mxu1 %v355_v14  ;;  %v471_v61 = vsub.s32 3, %v2379_v33 }
  0xbb   :  { %1180 = vmatprep.mubr.bf16.mxu0 %v2278_v62  ;;  %1212 = vmatprep.mubr.bf16.mxu1 %v358_v17  ;;  %v2391_v62 = vrot.slane %v2383_v35, %v459_v58 }
  0xbc   :  { %v2397_v28 = vrot.slane %v2383_v35, %v471_v61 }
  0xc2   :  { %1181 = vmatmul.mubr.bf16.gmra.mxu0 %v2294_v20  ;;  %1213 = vmatmul.mubr.bf16.gmra.mxu1 %v357_v22 }
 0x12a   :  { %v932_v20 = vpop.f32.mrf.mxu0  ;;  %v1045_v26 = vpop.f32.mrf.mxu1 }
 0x12b   :  { %v1046_v25 = vadd.f32 %v1045_v26, %v2388_v23  ;;  %v933_v29 = vadd.f32 %v932_v20, %v2391_v62 }
 0x12c   :  { %v934_v36 = vpop.f32.mrf.mxu0  ;;  %v1047_v37 = vpop.f32.mrf.mxu1 }
 0x12d   :  { %v935_v38 = vadd.f32 %v934_v36, %v2394_v27  ;;  %v1048_v39 = vadd.f32 %v1047_v37, %v2397_v28  ;;  %v1223_v40 = vmax.f32 %v1046_v25, 0.0  ;;  %v1221_v43 = vmax.f32 %v933_v29, 0.0 }
 0x12e   :  { %v936_v30 = vpop.f32.mrf.mxu0  ;;  %v1049_v24 = vpop.f32.mrf.mxu1 }
 0x12f   :  { %v937_v31 = vadd.f32 %v936_v30, %v2391_v62  ;;  %v1050_v42 = vadd.f32 %v1049_v24, %v2388_v23  ;;  %v1222_v49 = vmax.f32 %v935_v38, 0.0  ;;  %v1224_v50 = vmax.f32 %v1048_v39, 0.0 }
 0x130   :  { %v938_v44 = vpop.f32.mrf.mxu0  ;;  %v1051_v46 = vpop.f32.mrf.mxu1 }
 0x131   :  { %v1226_v32 = vmax.f32 %v937_v31, 0.0  ;;  %v1228_v45 = vmax.f32 %v1050_v42, 0.0  ;;  %v939_v48 = vadd.f32 %v938_v44, %v2394_v27  ;;  %v1052_v47 = vadd.f32 %v1051_v46, %v2397_v28 }
 0x132   :  { %v942_v51 = vpop.f32.mrf.mxu0  ;;  %v1055_v52 = vpop.f32.mrf.mxu1 }
 0x133   :  { %v1301_v53 = vadd.f32 %v1226_v32, %v1221_v43  ;;  %v1315_v54 = vadd.f32 %v1228_v45, %v1223_v40  ;;  %v1227_v55 = vmax.f32 %v939_v48, 0.0  ;;  %v1229_v56 = vmax.f32 %v1052_v47, 0.0 }
 0x134   :  { %v943_v57 = vadd.f32 %v942_v51, %v2391_v62  ;;  %v1056_v59 = vadd.f32 %v1055_v52, %v2388_v23  ;;  %v944_v1 = vpop.f32.mrf.mxu0  ;;  %v1057_v3 = vpop.f32.mrf.mxu1 }
 0x135   :  { %v1302_v63 = vrot.slane %v1301_v53, 4  ;;  %v1316_v2 = vrot.slane %v1315_v54, 4  ;;  %v1308_v4 = vadd.f32 %v1227_v55, %v1222_v49  ;;  %v1322_v5 = vadd.f32 %v1229_v56, %v1224_v50 }
 0x136   :  { %v945_v6 = vadd.f32 %v944_v1, %v2394_v27  ;;  %v946_v7 = vpop.f32.mrf.mxu0  ;;  %v1059_v60 = vpop.f32.mrf.mxu1  ;;  %v1058_v8 = vadd.f32 %v1057_v3, %v2397_v28  ;;  %v1233_v12 = vmax.f32 %v1056_v59, 0.0  ;;  %v1231_v21 = vmax.f32 %v943_v57, 0.0 }
 0x137   :  { %v1303_v10 = vadd.f32 %v1302_v63, %v1301_v53  ;;  %v1317_v11 = vadd.f32 %v1316_v2, %v1315_v54  ;;  %v1309_v0 = vrot.slane %v1308_v4, 4  ;;  %v947_v14 = vadd.f32 %v946_v7, %v2391_v62 }
 0x138   :  { %v1060_v13 = vadd.f32 %v1059_v60, %v2388_v23  ;;  %v948_v15 = vpop.f32.mrf.mxu0  ;;  %v1061_v16 = vpop.f32.mrf.mxu1  ;;  %v1323_v19 = vrot.slane %v1322_v5, 4  ;;  %v1232_v26 = vmax.f32 %v945_v6, 0.0  ;;  %v1234_v25 = vmax.f32 %v1058_v8, 0.0 }
 0x139   :  { %v1304_v18 = vrot.slane %v1303_v10, 2  ;;  %v1318_v17 = vrot.slane %v1317_v11, 2  ;;  %v1236_v22 = vmax.f32 %v947_v14, 0.0  ;;  %v949_v34 = vadd.f32 %v948_v15, %v2394_v27 }
 0x13a   :  { %v1238_v41 = vmax.f32 %v1060_v13, 0.0  ;;  %v1062_v58 = vadd.f32 %v1061_v16, %v2397_v28  ;;  %v952_v9 = vpop.f32.mrf.mxu0  ;;  %v1065_v61 = vpop.f32.mrf.mxu1  ;;  %v1310_v20 = vadd.f32 %v1309_v0, %v1308_v4  ;;  %v1324_v31 = vadd.f32 %v1323_v19, %v1322_v5 }
 0x13b   :  { %v1336_v29 = vadd.f32 %v1236_v22, %v1231_v21  ;;  %v1237_v37 = vmax.f32 %v949_v34, 0.0  ;;  %v1305_v24 = vadd.f32 %v1304_v18, %v1303_v10  ;;  %v1319_v40 = vadd.f32 %v1318_v17, %v1317_v11 }
 0x13c   :  { %v1350_v36 = vadd.f32 %v1238_v41, %v1233_v12  ;;  %v1239_v38 = vmax.f32 %v1062_v58, 0.0  ;;  %v954_v39 = vpop.f32.mrf.mxu0  ;;  %v1067_v30 = vpop.f32.mrf.mxu1  ;;  %v1311_v48 = vrot.slane %v1310_v20, 2  ;;  %v1325_v54 = vrot.slane %v1324_v31, 2 }
 0x13d   :  { %v1337_v42 = vrot.slane %v1336_v29, 4  ;;  %v1343_v44 = vadd.f32 %v1237_v37, %v1232_v26  ;;  %v1306_v53 = vrot.slane %v1305_v24, 1  ;;  %v475_v55 = vsub.s32 4, %v2379_v33 }
 0x13e   :  { %v1351_v43 = vrot.slane %v1350_v36, 4  ;;  %v1357_v46 = vadd.f32 %v1239_v38, %v1234_v25  ;;  %v956_v32 = vpop.f32.mrf.mxu0  ;;  %v1069_v45 = vpop.f32.mrf.mxu1  ;;  %v1320_v56 = vrot.slane %v1319_v40, 1  ;;  %v1312_v3 = vadd.f32 %v1311_v48, %v1310_v20 }
 0x13f   :  { %v1338_v47 = vadd.f32 %v1337_v42, %v1336_v29  ;;  %v1344_v50 = vrot.slane %v1343_v44, 4  ;;  %v1066_v63 = vadd.f32 %v1065_v61, %v2388_v23  ;;  %v953_v6 = vadd.f32 %v952_v9, %v2391_v62 }
 0x140   :  { %v1352_v49 = vadd.f32 %v1351_v43, %v1350_v36  ;;  %v958_v51 = vpop.f32.mrf.mxu0  ;;  %v1071_v52 = vpop.f32.mrf.mxu1  ;;  %v1358_v57 = vrot.slane %v1357_v46, 4  ;;  %v2420_v10 = vadd.f32 %v1306_v53, %v1305_v24  ;;  %v1326_v11 = vadd.f32 %v1325_v54, %v1324_v31 }
 0x141   :  { %v1339_v2 = vrot.slane %v1338_v47, 2  ;;  %v1345_v5 = vadd.f32 %v1344_v50, %v1343_v44  ;;  %v2423_v33 = vrot.slane %v2383_v35, %v475_v55  ;;  %v2425_v0 = vadd.f32 %v1320_v56, %v1319_v40 }
 0x142   :  { %v962_v59 = vpop.f32.mrf.mxu0  ;;  %v1075_v1 = vpop.f32.mrf.mxu1  ;;  %v1353_v4 = vrot.slane %v1352_v49, 2  ;;  %v1359_v8 = vadd.f32 %v1358_v57, %v1357_v46  ;;  %v955_v12 = vadd.f32 %v954_v39, %v2394_v27  ;;  %v1068_v14 = vadd.f32 %v1067_v30, %v2397_v28 }
 0x143   :  { %2754 = vst [vmem:[#allocation12_spill] sm:$0xff] %v2423_v33  ;;  %v1313_v16 = vrot.slane %v1312_v3, 1  ;;  %v1243_v18 = vmax.f32 %v1066_v63, 0.0  ;;  %v957_v17 = vadd.f32 %v956_v32, %v2391_v62  ;;  %v1070_v19 = vadd.f32 %v1069_v45, %v2388_v23 }
 0x144   :  { %v964_v7 = vpop.f32.mrf.mxu0  ;;  %v2418_v60 = vpop.f32.mrf.mxu1  ;;  %v1340_v21 = vadd.f32 %v1339_v2, %v1338_v47  ;;  %v1354_v22 = vadd.f32 %v1353_v4, %v1352_v49  ;;  %v1346_v41 = vrot.slane %v1345_v5, 2  ;;  %v1241_v35 = vmax.f32 %v953_v6, 0.0 }
 0x145   :  { %v1246_v9 = vmax.f32 %v957_v17, 0.0  ;;  %v1248_v61 = vmax.f32 %v1070_v19, 0.0  ;;  %v959_v20 = vadd.f32 %v958_v51, %v2394_v27  ;;  %v1072_v26 = vadd.f32 %v1071_v52, %v2397_v28 }
 0x146   :  { %v966_v13 = vpop.f32.mrf.mxu0  ;;  %v1079_v15 = vpop.f32.mrf.mxu1  ;;  %v1327_v25 = vrot.slane %v1326_v11, 1  ;;  %v1360_v29 = vrot.slane %v1359_v8, 2  ;;  %v1242_v36 = vmax.f32 %v955_v12, 0.0  ;;  %v1244_v37 = vmax.f32 %v1068_v14, 0.0 }
 0x147   :  { %v1371_v30 = vadd.f32 %v1246_v9, %v1241_v35  ;;  %v1385_v24 = vadd.f32 %v1248_v61, %v1243_v18  ;;  %v1247_v40 = vmax.f32 %v959_v20, 0.0  ;;  %v1249_v31 = vmax.f32 %v1072_v26, 0.0 }
 0x148   :  { %v968_v34 = vpop.f32.mrf.mxu0  ;;  %v1081_v58 = vpop.f32.mrf.mxu1  ;;  %v2437_v42 = vadd.f32 %v1313_v16, %v1312_v3  ;;  %v1341_v43 = vrot.slane %v1340_v21, 1  ;;  %v1355_v44 = vrot.slane %v1354_v22, 1  ;;  %v1347_v46 = vadd.f32 %v1346_v41, %v1345_v5 }
 0x149   :  { %v1372_v48 = vrot.slane %v1371_v30, 4  ;;  %v1386_v47 = vrot.slane %v1385_v24, 4  ;;  %v1378_v49 = vadd.f32 %v1247_v40, %v1242_v36  ;;  %v1392_v50 = vadd.f32 %v1249_v31, %v1244_v37 }
 0x14a   :  { %v2433_v38 = vpop.f32.mrf.mxu0  ;;  %v2435_v39 = vpop.f32.mrf.mxu1  ;;  %v2443_v51 = vadd.f32 %v1327_v25, %v1326_v11  ;;  %v1361_v52 = vadd.f32 %v1360_v29, %v1359_v8  ;;  %v963_v53 = vadd.f32 %v962_v59, %v2391_v62  ;;  %v1076_v54 = vadd.f32 %v1075_v1, %v2388_v23 }
 0x14b   :  { %v1373_v57 = vadd.f32 %v1372_v48, %v1371_v30  ;;  %v1387_v3 = vadd.f32 %v1386_v47, %v1385_v24  ;;  %v1379_v63 = vrot.slane %v1378_v49, 4  ;;  %v1393_v2 = vrot.slane %v1392_v50, 4 }
 0x14c   :  { %v2439_v32 = vpop.f32.mrf.mxu0  ;;  %v2441_v45 = vpop.f32.mrf.mxu1  ;;  %v1342_v4 = vadd.f32 %v1341_v43, %v1340_v21  ;;  %v1356_v5 = vadd.f32 %v1355_v44, %v1354_v22  ;;  %v1348_v6 = vrot.slane %v1347_v46, 1  ;;  %v965_v12 = vadd.f32 %v964_v7, %v2394_v27 }
 0x14d   :  { %v1374_v59 = vrot.slane %v1373_v57, 2  ;;  %v1388_v14 = vrot.slane %v1387_v3, 2  ;;  %v1380_v1 = vadd.f32 %v1379_v63, %v1378_v49  ;;  %v1078_v16 = vadd.f32 %v2418_v60, %v2397_v28 }
 0x14e   :  { %v2447_v55 = vpop.f32.mrf.mxu0  ;;  %v2449_v56 = vpop.f32.mrf.mxu1  ;;  %v1362_v18 = vrot.slane %v1361_v52, 1  ;;  %v1253_v17 = vmax.f32 %v1076_v54, 0.0  ;;  %v967_v19 = vadd.f32 %v966_v13, %v2391_v62  ;;  %v1080_v21 = vadd.f32 %v1079_v15, %v2388_v23 }
 0x14f   :  { %v1375_v41 = vadd.f32 %v1374_v59, %v1373_v57  ;;  %v1389_v35 = vadd.f32 %v1388_v14, %v1387_v3  ;;  %v1394_v9 = vadd.f32 %v1393_v2, %v1392_v50  ;;  %v1251_v61 = vmax.f32 %v963_v53, 0.0 }
 0x150   :  { %v2452_v11 = vpop.f32.mrf.mxu0  ;;  %v2454_v8 = vpop.f32.mrf.mxu1  ;;  %v1256_v20 = vmax.f32 %v967_v19, 0.0  ;;  %v1258_v26 = vmax.f32 %v1080_v21, 0.0  ;;  %v969_v25 = vadd.f32 %v968_v34, %v2394_v27  ;;  %v1082_v60 = vadd.f32 %v1081_v58, %v2397_v28 }
 0x151   :  { %v1349_v13 = vadd.f32 %v1348_v6, %v1347_v46  ;;  %v1381_v15 = vrot.slane %v1380_v1, 2  ;;  %v1252_v37 = vmax.f32 %v965_v12, 0.0  ;;  %v1254_v30 = vmax.f32 %v1078_v16, 0.0 }
 0x152   :  { %v2460_v22 = vpop.f32.mrf.mxu0  ;;  %v2462_v7 = vpop.f32.mrf.mxu1  ;;  %v1406_v24 = vadd.f32 %v1256_v20, %v1251_v61  ;;  %v1420_v40 = vadd.f32 %v1258_v26, %v1253_v17  ;;  %v1257_v31 = vmax.f32 %v969_v25, 0.0  ;;  %v1259_v43 = vmax.f32 %v1082_v60, 0.0 }
 0x153   :  { %v1363_v47 = vadd.f32 %v1362_v18, %v1361_v52  ;;  %v1376_v34 = vrot.slane %v1375_v41, 1  ;;  %v1390_v49 = vrot.slane %v1389_v35, 1  ;;  %v1395_v58 = vrot.slane %v1394_v9, 2 }
 0x154   :  { %v2466_v29 = vpop.f32.mrf.mxu0  ;;  %v2468_v36 = vpop.f32.mrf.mxu1  ;;  %v1407_v50 = vrot.slane %v1406_v24, 4  ;;  %v1421_v53 = vrot.slane %v1420_v40, 4  ;;  %v1413_v54 = vadd.f32 %v1257_v31, %v1252_v37  ;;  %v1427_v57 = vadd.f32 %v1259_v43, %v1254_v30 }
 0x155   :  { %v1581_v63 = vmul.f32 0.0625, %v2420_v10  ;;  %v1586_v2 = vmul.f32 0.0625, %v1342_v4  ;;  %v1588_v6 = vmul.f32 0.0625, %v1356_v5  ;;  %v1382_v12 = vadd.f32 %v1381_v15, %v1380_v1 }
 0x156   :  { %v2470_v44 = vpop.f32.mrf.mxu0  ;;  %v2472_v48 = vpop.f32.mrf.mxu1  ;;  %v1583_v59 = vmul.f32 0.0625, %v2425_v0  ;;  %v1408_v14 = vadd.f32 %v1407_v50, %v1406_v24  ;;  %v1414_v52 = vrot.slane %v1413_v54, 4  ;;  %v1428_v16 = vrot.slane %v1427_v57, 4 }
 0x157   :  { %v1587_v19 = vmul.f32 0.0625, %v1349_v13  ;;  %v1589_v21 = vmul.f32 0.0625, %v1363_v47  ;;  %v1377_v61 = vadd.f32 %v1376_v34, %v1375_v41  ;;  %v1396_v20 = vadd.f32 %v1395_v58, %v1394_v9 }
 0x158   :  { %v2474_v46 = vpop.f32.mrf.mxu0  ;;  %v2476_v3 = vpop.f32.mrf.mxu1  ;;  %v1582_v26 = vmul.f32 0.0625, %v2437_v42  ;;  %v1584_v10 = vmul.f32 0.0625, %v2443_v51  ;;  %v1391_v4 = vadd.f32 %v1390_v49, %v1389_v35  ;;  %v1422_v5 = vadd.f32 %v1421_v53, %v1420_v40 }
 0x159   :  { %v2491_v25 = vsel %vm1661_vm0, %v1586_v2, %v1581_v63  ;;  %v2494_v60 = vsel %vm1661_vm0, %v1588_v6, %v1583_v59  ;;  %v1383_v13 = vrot.slane %v1382_v12, 1  ;;  %v1086_v41 = vadd.f32 %v2435_v39, %v2388_v23 }
 0x15a   :  { %v2480_v18 = vpop.f32.mrf.mxu0  ;;  %v2482_v17 = vpop.f32.mrf.mxu1  ;;  %v1409_v9 = vrot.slane %v1408_v14, 2  ;;  %v1415_v42 = vadd.f32 %v1414_v52, %v1413_v54  ;;  %v1429_v15 = vadd.f32 %v1428_v16, %v1427_v57  ;;  %v973_v51 = vadd.f32 %v2433_v38, %v2391_v62 }
 0x15b   :  { %v2505_v30 = vsel %vm1661_vm0, %v1587_v19, %v1582_v26  ;;  %v2508_v24 = vsel %vm1661_vm0, %v1589_v21, %v1584_v10  ;;  %v2510_v40 = vmul.f32 0.0625, %v1377_v61  ;;  %v1397_v31 = vrot.slane %v1396_v20, 1 }
 0x15c   :  { %v2486_v1 = vpop.f32.mrf.mxu0  ;;  %v2488_v0 = vpop.f32.mrf.mxu1  ;;  %v2512_v39 = vmul.f32 0.0625, %v1391_v4  ;;  %v1423_v43 = vrot.slane %v1422_v5, 2  ;;  %v975_v47 = vadd.f32 %v2439_v32, %v2394_v27  ;;  %v1088_v38 = vadd.f32 %v2441_v45, %v2397_v28 }
 0x15d   :  { %v1384_v58 = vadd.f32 %v1383_v13, %v1382_v12  ;;  %v1263_v50 = vmax.f32 %v1086_v41, 0.0  ;;  %v977_v53 = vadd.f32 %v2447_v55, %v2391_v62  ;;  %v1090_v54 = vadd.f32 %v2449_v56, %v2388_v23 }
 0x15e   :  { %v2500_v35 = vpop.f32.mrf.mxu0  ;;  %v2502_v37 = vpop.f32.mrf.mxu1  ;;  %v1410_v57 = vadd.f32 %v1409_v9, %v1408_v14  ;;  %v1416_v63 = vrot.slane %v1415_v42, 2  ;;  %v1430_v2 = vrot.slane %v1429_v15, 2  ;;  %v1261_v6 = vmax.f32 %v973_v51, 0.0 }
 0x15f   :  { %v1266_v45 = vmax.f32 %v977_v53, 0.0  ;;  %v1268_v52 = vmax.f32 %v1090_v54, 0.0  ;;  %v979_v12 = vadd.f32 %v2452_v11, %v2394_v27  ;;  %v1092_v16 = vadd.f32 %v2454_v8, %v2397_v28 }
 0x160   :  { %v2518_v34 = vpop.f32.mrf.mxu0  ;;  %v2520_v49 = vpop.f32.mrf.mxu1  ;;  %v1398_v55 = vadd.f32 %v1397_v31, %v1396_v20  ;;  %v1424_v19 = vadd.f32 %v1423_v43, %v1422_v5  ;;  %v1262_v21 = vmax.f32 %v975_v47, 0.0  ;;  %v1264_v56 = vmax.f32 %v1088_v38, 0.0 }
 0x161   :  { %v1441_v26 = vadd.f32 %v1266_v45, %v1261_v6  ;;  %v1455_v10 = vadd.f32 %v1268_v52, %v1263_v50  ;;  %v1267_v4 = vmax.f32 %v979_v12, 0.0  ;;  %v1269_v13 = vmax.f32 %v1092_v16, 0.0 }
 0x162   :  { %v2526_v32 = vpop.f32.mrf.mxu0  ;;  %v2528_v59 = vpop.f32.mrf.mxu1  ;;  %v2538_v41 = vmul.f32 0.0625, %v1384_v58  ;;  %v1411_v9 = vrot.slane %v1410_v57, 1  ;;  %v1417_v51 = vadd.f32 %v1416_v63, %v1415_v42  ;;  %v1431_v11 = vadd.f32 %v1430_v2, %v1429_v15 }
 0x163   :  { %v1442_v20 = vrot.slane %v1441_v26, 4  ;;  %v1456_v5 = vrot.slane %v1455_v10, 4  ;;  %v1448_v31 = vadd.f32 %v1267_v4, %v1262_v21  ;;  %v1462_v43 = vadd.f32 %v1269_v13, %v1264_v56 }
 0x164   :  { %v2534_v14 = vpop.f32.mrf.mxu0  ;;  %v2536_v61 = vpop.f32.mrf.mxu1  ;;  %v2544_v47 = vmul.f32 0.0625, %v1398_v55  ;;  %v1425_v38 = vrot.slane %v1424_v19, 1  ;;  %v983_v50 = vadd.f32 %v2460_v22, %v2391_v62  ;;  %v1096_v58 = vadd.f32 %v2462_v7, %v2388_v23 }
 0x165   :  { %v1443_v54 = vadd.f32 %v1442_v20, %v1441_v26  ;;  %v1457_v63 = vadd.f32 %v1456_v5, %v1455_v10  ;;  %v1449_v2 = vrot.slane %v1448_v31, 4  ;;  %v1463_v6 = vrot.slane %v1462_v43, 4 }
 0x166   :  { %v2540_v53 = vpop.f32.mrf.mxu0  ;;  %v2542_v8 = vpop.f32.mrf.mxu1  ;;  %v1412_v45 = vadd.f32 %v1411_v9, %v1410_v57  ;;  %v1418_v52 = vrot.slane %v1417_v51, 1  ;;  %v1432_v12 = vrot.slane %v1431_v11, 1  ;;  %v985_v16 = vadd.f32 %v2466_v29, %v2394_v27 }
 0x167   :  { %v1444_v21 = vrot.slane %v1443_v54, 2  ;;  %v1458_v7 = vrot.slane %v1457_v63, 2  ;;  %v1450_v56 = vadd.f32 %v1449_v2, %v1448_v31  ;;  %v1464_v4 = vadd.f32 %v1463_v6, %v1462_v43 }
 0x168   :  { %v2550_v42 = vpop.f32.mrf.mxu0  ;;  %v2552_v15 = vpop.f32.mrf.mxu1  ;;  %v1271_v13 = vmax.f32 %v983_v50, 0.0  ;;  %v1273_v26 = vmax.f32 %v1096_v58, 0.0  ;;  %v987_v10 = vadd.f32 %v2470_v44, %v2391_v62  ;;  %v1100_v57 = vadd.f32 %v2472_v48, %v2388_v23 }
 0x169   :  { %2755 = vst [vmem:[#allocation13_spill] sm:$0xff] %v2550_v42  ;;  %2756 = vst [vmem:[#allocation14_spill] sm:$0xff] %v2552_v15  ;;  %v1445_v9 = vadd.f32 %v1444_v21, %v1443_v54  ;;  %v1459_v20 = vadd.f32 %v1458_v7, %v1457_v63  ;;  %v1451_v29 = vrot.slane %v1450_v56, 2  ;;  %v1098_v5 = vadd.f32 %v2468_v36, %v2397_v28 }
 0x16a   :  { %v2556_v55 = vpop.f32.mrf.mxu0  ;;  %v2558_v22 = vpop.f32.mrf.mxu1  ;;  %v1276_v31 = vmax.f32 %v987_v10, 0.0  ;;  %v1278_v43 = vmax.f32 %v1100_v57, 0.0  ;;  %v989_v50 = vadd.f32 %v2474_v46, %v2394_v27  ;;  %v1102_v44 = vadd.f32 %v2476_v3, %v2397_v28 }
 0x16b   :  { %2757 = vst [vmem:[#allocation15_spill] sm:$0xff] %v2556_v55  ;;  %2758 = vst [vmem:[#allocation16_spill] sm:$0xff] %v2558_v22  ;;  %v1426_v58 = vadd.f32 %v1425_v38, %v1424_v19  ;;  %v1419_v48 = vadd.f32 %v1418_v52, %v1417_v51  ;;  %v1465_v54 = vrot.slane %v1464_v4, 2  ;;  %v1272_v63 = vmax.f32 %v985_v16, 0.0 }
 0x16c   :  { %v2566_v33 = vpop.f32.mrf.mxu0  ;;  %v2568_v22 = vpop.f32.mrf.mxu1  ;;  %v1476_v2 = vadd.f32 %v1276_v31, %v1271_v13  ;;  %v1490_v6 = vadd.f32 %v1278_v43, %v1273_v26  ;;  %v1277_v21 = vmax.f32 %v989_v50, 0.0  ;;  %v1279_v36 = vmax.f32 %v1102_v44, 0.0 }
 0x16d   :  { %2759 = vst [vmem:[#allocation17_spill] sm:$0xff] %v2566_v33  ;;  %2760 = vst [vmem:[#allocation18_spill] sm:$0xff] %v2568_v22  ;;  %v1433_v7 = vadd.f32 %v1432_v12, %v1431_v11  ;;  %v1446_v33 = vrot.slane %v1445_v9, 1  ;;  %v1460_v55 = vrot.slane %v1459_v20, 1  ;;  %v1274_v22 = vmax.f32 %v1098_v5, 0.0 }
 0x16e   :  { %v2574_v10 = vpop.f32.mrf.mxu0  ;;  %v2576_v57 = vpop.f32.mrf.mxu1  ;;  %v1452_v46 = vadd.f32 %v1451_v29, %v1450_v56  ;;  %v1477_v15 = vrot.slane %v1476_v2, 4  ;;  %v1491_v42 = vrot.slane %v1490_v6, 4  ;;  %v1483_v3 = vadd.f32 %v1277_v21, %v1272_v63 }
 0x16f   :  { %v1664_v19 = vsel %vm1663_vm1, %v2510_v40, %v2491_v25  ;;  %v1596_v51 = vmul.f32 0.0625, %v1412_v45  ;;  %v1598_v38 = vmul.f32 0.0625, %v1426_v58  ;;  %v1466_v52 = vadd.f32 %v1465_v54, %v1464_v4 }
 0x170   :  { %v1683_v11 = vsel %vm1663_vm1, %v2512_v39, %v2494_v60  ;;  %v1478_v12 = vadd.f32 %v1477_v15, %v1476_v2  ;;  %v1492_v16 = vadd.f32 %v1491_v42, %v1490_v6  ;;  %v1497_v13 = vadd.f32 %v1279_v36, %v1274_v22  ;;  %v2584_v31 = vpop.f32.mrf.mxu0  ;;  %v2586_v43 = vpop.f32.mrf.mxu1 }
 0x171   :  { %v1597_v26 = vmul.f32 0.0625, %v1419_v48  ;;  %v1599_v56 = vmul.f32 0.0625, %v1433_v7  ;;  %v1447_v29 = vadd.f32 %v1446_v33, %v1445_v9  ;;  %v1461_v5 = vadd.f32 %v1460_v55, %v1459_v20 }
 0x172   :  { %v1676_v25 = vsel %vm1663_vm1, %v2538_v41, %v2505_v30  ;;  %v1690_v40 = vsel %vm1663_vm1, %v2544_v47, %v2508_v24  ;;  %v1453_v60 = vrot.slane %v1452_v46, 1  ;;  %v1484_v39 = vrot.slane %v1483_v3, 4  ;;  %v2610_v20 = vpop.f32.mrf.mxu0  ;;  %v2612_v50 = vpop.f32.mrf.mxu1 }
 0x173   :  { %v1666_v42 = vsel %vm1665_vm2, %v1596_v51, %v1664_v19  ;;  %v2596_v15 = vsel %vm1665_vm2, %v1598_v38, %v1683_v11  ;;  %v1467_v33 = vrot.slane %v1466_v52, 1  ;;  %v1106_v45 = vadd.f32 %v2482_v17, %v2388_v23 }
 0x174   :  { %v1479_v55 = vrot.slane %v1478_v12, 2  ;;  %v1493_v22 = vrot.slane %v1492_v16, 2  ;;  %v1498_v4 = vrot.slane %v1497_v13, 4  ;;  %v993_v30 = vadd.f32 %v2480_v18, %v2391_v62  ;;  %v2626_v19 = vpop.f32.mrf.mxu0  ;;  %v2628_v51 = vpop.f32.mrf.mxu1 }
 0x175   :  { %v2603_v41 = vsel %vm1665_vm2, %v1597_v26, %v1676_v25  ;;  %v2606_v24 = vsel %vm1665_vm2, %v1599_v56, %v1690_v40  ;;  %v1601_v47 = vmul.f32 0.0625, %v1447_v29  ;;  %v2608_v9 = vmul.f32 0.0625, %v1461_v5 }
 0x176   :  { %v1454_v17 = vadd.f32 %v1453_v60, %v1452_v46  ;;  %v1485_v44 = vadd.f32 %v1484_v39, %v1483_v3  ;;  %v995_v58 = vadd.f32 %v2486_v1, %v2394_v27  ;;  %v1108_v18 = vadd.f32 %v2488_v0, %v2397_v28  ;;  %v2635_v60 = vpop.f32.mrf.mxu0  ;;  %v2637_v39 = vpop.f32.mrf.mxu1 }
 0x177   :  { %v1468_v48 = vadd.f32 %v1467_v33, %v1466_v52  ;;  %v1283_v54 = vmax.f32 %v1106_v45, 0.0  ;;  %v997_v63 = vadd.f32 %v2500_v35, %v2391_v62  ;;  %v1110_v2 = vadd.f32 %v2502_v37, %v2388_v23 }
 0x178   :  { %v1480_v6 = vadd.f32 %v1479_v55, %v1478_v12  ;;  %v1494_v21 = vadd.f32 %v1493_v22, %v1492_v16  ;;  %v1499_v36 = vadd.f32 %v1498_v4, %v1497_v13  ;;  %v1281_v7 = vmax.f32 %v993_v30, 0.0 }
 0x179   :  { %v1286_v46 = vmax.f32 %v997_v63, 0.0  ;;  %v1288_v3 = vmax.f32 %v1110_v2, 0.0  ;;  %v999_v1 = vadd.f32 %v2518_v34, %v2394_v27  ;;  %v1112_v0 = vadd.f32 %v2520_v49, %v2397_v28 }
 0x17a   :  { %v2631_v35 = vsel %vm1667_vm3, %v1601_v47, %v1666_v42  ;;  %v1486_v37 = vrot.slane %v1485_v44, 2  ;;  %v1282_v38 = vmax.f32 %v995_v58, 0.0  ;;  %v1284_v52 = vmax.f32 %v1108_v18, 0.0 }
 0x17b   :  { %v1511_v11 = vadd.f32 %v1286_v46, %v1281_v7  ;;  %v1525_v12 = vadd.f32 %v1288_v3, %v1283_v54  ;;  %v1287_v16 = vmax.f32 %v999_v1, 0.0  ;;  %v1289_v13 = vmax.f32 %v1112_v0, 0.0  ;;  %v2649_v7 = vpop.f32.mrf.mxu1 }
 0x17c   :  { %v2633_v26 = vmul.f32 0.0625, %v1454_v17  ;;  %v1481_v34 = vrot.slane %v1480_v6, 1  ;;  %v1495_v56 = vrot.slane %v1494_v21, 1  ;;  %v1500_v29 = vrot.slane %v1499_v36, 2 }
 0x17d   :  { %v1512_v49 = vrot.slane %v1511_v11, 4  ;;  %v1526_v5 = vrot.slane %v1525_v12, 4  ;;  %v1518_v25 = vadd.f32 %v1287_v16, %v1282_v38  ;;  %v1532_v40 = vadd.f32 %v1289_v13, %v1284_v52  ;;  %v2762_v52 = vld [vmem:[#allocation14_spill] sm:$0xff] }
 0x17e   :  { %v1604_v42 = vmul.f32 0.0625, %v1468_v48  ;;  %v1487_v33 = vadd.f32 %v1486_v37, %v1485_v44  ;;  %v1003_v45 = vadd.f32 %v2526_v32, %v2391_v62  ;;  %v1116_v55 = vadd.f32 %v2528_v59, %v2388_v23  ;;  %v2647_v32 = vpop.f32.mrf.mxu0 }
 0x17f   :  { %v1513_v22 = vadd.f32 %v1512_v49, %v1511_v11  ;;  %v1527_v4 = vadd.f32 %v1526_v5, %v1525_v12  ;;  %v1519_v30 = vrot.slane %v1518_v25, 4  ;;  %v1533_v47 = vrot.slane %v1532_v40, 4 }
 0x180   :  { %v1482_v17 = vadd.f32 %v1481_v34, %v1480_v6  ;;  %v1496_v58 = vadd.f32 %v1495_v56, %v1494_v21  ;;  %v1501_v18 = vadd.f32 %v1500_v29, %v1499_v36  ;;  %v1005_v54 = vadd.f32 %v2534_v14, %v2394_v27 }
 0x181   :  { %v1514_v63 = vrot.slane %v1513_v22, 2  ;;  %v1520_v2 = vadd.f32 %v1519_v30, %v1518_v25  ;;  %v1534_v48 = vadd.f32 %v1533_v47, %v1532_v40  ;;  %v1118_v44 = vadd.f32 %v2536_v61, %v2397_v28  ;;  %v2761_v61 = vld [vmem:[#allocation13_spill] sm:$0xff] }
 0x182   :  { %v1291_v59 = vmax.f32 %v1003_v45, 0.0  ;;  %v1293_v46 = vmax.f32 %v1116_v55, 0.0  ;;  %v1007_v6 = vadd.f32 %v2540_v53, %v2391_v62  ;;  %v1120_v21 = vadd.f32 %v2542_v8, %v2388_v23  ;;  %v2659_v62 = vpop.f32.mrf.mxu0  ;;  %v2661_v53 = vpop.f32.mrf.mxu1 }
 0x183   :  { %v1515_v14 = vadd.f32 %v1514_v63, %v1513_v22  ;;  %v1528_v36 = vrot.slane %v1527_v4, 2  ;;  %v1521_v3 = vrot.slane %v1520_v2, 2  ;;  %v1535_v1 = vrot.slane %v1534_v48, 2 }
 0x184   :  { %v1296_v0 = vmax.f32 %v1007_v6, 0.0  ;;  %v1298_v37 = vmax.f32 %v1120_v21, 0.0  ;;  %v1009_v38 = vadd.f32 %v2761_v61, %v2394_v27  ;;  %v1122_v11 = vadd.f32 %v2762_v52, %v2397_v28  ;;  %v2666_v63 = vpop.f32.mrf.mxu0 }
 0x185   :  { %v1488_v12 = vrot.slane %v1487_v33, 1  ;;  %v1502_v16 = vrot.slane %v1501_v18, 1  ;;  %v1292_v13 = vmax.f32 %v1005_v54, 0.0  ;;  %v1294_v34 = vmax.f32 %v1118_v44, 0.0  ;;  %v2668_v44 = vpop.f32.mrf.mxu1 }
 0x186   :  { %v1546_v23 = vadd.f32 %v1296_v0, %v1291_v59  ;;  %v1560_v8 = vadd.f32 %v1298_v37, %v1293_v46  ;;  %v1297_v56 = vmax.f32 %v1009_v38, 0.0  ;;  %v1299_v29 = vmax.f32 %v1122_v11, 0.0  ;;  %v1840_v37 = vpop.f32.mrf.mxu0 }
 0x187   :  { %v1516_v49 = vrot.slane %v1515_v14, 1  ;;  %v1529_v5 = vadd.f32 %v1528_v36, %v1527_v4  ;;  %v1522_v25 = vadd.f32 %v1521_v3, %v1520_v2  ;;  %v1536_v40 = vadd.f32 %v1535_v1, %v1534_v48  ;;  %v1864_v61 = vpop.f32.mrf.mxu1 }
 0x188   :  { %v1547_v27 = vrot.slane %v1546_v23, 4  ;;  %v1561_v45 = vrot.slane %v1560_v8, 4  ;;  %v1553_v55 = vadd.f32 %v1297_v56, %v1292_v13  ;;  %v1567_v28 = vadd.f32 %v1299_v29, %v1294_v34 }
 0x189   :  { %v1685_v22 = vsel %vm1667_vm3, %v2608_v9, %v2596_v15  ;;  %v1606_v30 = vmul.f32 0.0625, %v1482_v17  ;;  %v1489_v47 = vadd.f32 %v1488_v12, %v1487_v33  ;;  %v1503_v54 = vadd.f32 %v1502_v16, %v1501_v18 }
 0x18a   :  { %v1548_v59 = vadd.f32 %v1547_v27, %v1546_v23  ;;  %v1562_v4 = vadd.f32 %v1561_v45, %v1560_v8  ;;  %v1554_v2 = vrot.slane %v1553_v55, 4  ;;  %v1568_v48 = vrot.slane %v1567_v28, 4  ;;  %v2767_v27 = vld [vmem:[#allocation12_spill] sm:$0xff] }
 0x18b   :  { %v1678_v46 = vsel %vm1667_vm3, %v2633_v26, %v2603_v41  ;;  %v1692_v6 = vsel %vm1667_vm3, %v1604_v42, %v2606_v24  ;;  %v1608_v15 = vmul.f32 0.0625, %v1496_v58  ;;  %v1530_v9 = vrot.slane %v1529_v5, 1  ;;  %v2763_v41 = vld [vmem:[#allocation15_spill] sm:$0xff]  ;;  %v2764_v26 = vld [vmem:[#allocation17_spill] sm:$0xff]  ;;  %v2765_v24 = vld [vmem:[#allocation16_spill] sm:$0xff] }
 0x18c   :  { %v1517_v33 = vadd.f32 %v1516_v49, %v1515_v14  ;;  %v1523_v17 = vrot.slane %v1522_v25, 1  ;;  %v1537_v18 = vrot.slane %v1536_v40, 1  ;;  %v1555_v21 = vadd.f32 %v1554_v2, %v1553_v55  ;;  %v2766_v42 = vld [vmem:[#allocation18_spill] sm:$0xff]  ;;  %v1841_v55 = vpop.f32.mrf.mxu0 }
 0x18d   :  { %v1670_v36 = vsel %vm1669_vm4, %v1606_v30, %v2631_v35  ;;  %v1607_v3 = vmul.f32 0.0625, %v1489_v47  ;;  %v1549_v1 = vrot.slane %v1548_v59, 2  ;;  %v1563_v0 = vrot.slane %v1562_v4, 2 }
 0x18e   :  { %v1609_v38 = vmul.f32 0.0625, %v1503_v54  ;;  %v1569_v52 = vadd.f32 %v1568_v48, %v1567_v28  ;;  %v1827_v11 = vadd.f32 %v2764_v26, %v2763_v41  ;;  %v1851_v58 = vadd.f32 %v2766_v42, %v2765_v24  ;;  %v1865_v28 = vpop.f32.mrf.mxu1 }
 0x18f   :  { %v2682_v14 = vsel %vm1669_vm4, %v1608_v15, %v1685_v22  ;;  %v1556_v12 = vrot.slane %v1555_v21, 2  ;;  %v1830_v35 = vadd.f32 %v2584_v31, %v2574_v10  ;;  %v1854_v16 = vadd.f32 %v2586_v43, %v2576_v57 }
 0x190   :  { %v1611_v13 = vmul.f32 0.0625, %v1517_v33  ;;  %v1531_v34 = vadd.f32 %v1530_v9, %v1529_v5  ;;  %v1524_v23 = vadd.f32 %v1523_v17, %v1522_v25  ;;  %v1538_v8 = vadd.f32 %v1537_v18, %v1536_v40  ;;  %v1867_v15 = vpop.f32.mrf.mxu1 }
 0x191   :  { %v2689_v56 = vsel %vm1669_vm4, %v1607_v3, %v1678_v46  ;;  %v1550_v29 = vadd.f32 %v1549_v1, %v1548_v59  ;;  %v1564_v49 = vadd.f32 %v1563_v0, %v1562_v4  ;;  %v1162_v45 = vadd.f32 %v1830_v35, %v2767_v27 }
 0x192   :  { %v2693_v22 = vsel %vm1669_vm4, %v1609_v38, %v1692_v6  ;;  %v1570_v10 = vrot.slane %v1569_v52, 2  ;;  %v1159_v31 = vadd.f32 %v1827_v11, %v2767_v27  ;;  %v1191_v57 = vadd.f32 %v1851_v58, %v2767_v27  ;;  %v1843_v6 = vpop.f32.mrf.mxu0 }
 0x193   :  { %v1557_v43 = vadd.f32 %v1556_v12, %v1555_v21  ;;  %v1194_v5 = vadd.f32 %v1854_v16, %v2767_v27  ;;  %v1833_v25 = vadd.f32 %v2626_v19, %v2610_v20  ;;  %v1857_v40 = vadd.f32 %v2628_v51, %v2612_v50 }
 0x194   :  { %v2703_v30 = vsel %vm1671_vm5, %v1611_v13, %v1670_v36  ;;  %v1613_v47 = vmul.f32 0.0625, %v1531_v34  ;;  %v1612_v54 = vmul.f32 0.0625, %v1524_v23  ;;  %v2705_v59 = vmul.f32 0.0625, %v1538_v8 }
 0x195   :  { %v1551_v4 = vrot.slane %v1550_v29, 1  ;;  %v1565_v2 = vrot.slane %v1564_v49, 1  ;;  %v1230_v48 = vmax.f32 %v1162_v45, 0.0  ;;  %v1167_v46 = vadd.f32 %v1833_v25, %v2767_v27 }
 0x196   :  { %v1571_v9 = vadd.f32 %v1570_v10, %v1569_v52  ;;  %v1225_v33 = vmax.f32 %v1159_v31, 0.0  ;;  %v1836_v20 = vadd.f32 %v2647_v32, %v2635_v60  ;;  %v1860_v50 = vadd.f32 %v2649_v7, %v2637_v39  ;;  %v1844_v39 = vpop.f32.mrf.mxu0  ;;  %v1868_v7 = vpop.f32.mrf.mxu1 }
 0x197   :  { %v1558_v19 = vrot.slane %v1557_v43, 1  ;;  %v1265_v51 = vmax.f32 %v1191_v57, 0.0  ;;  %v1270_v17 = vmax.f32 %v1194_v5, 0.0  ;;  %v1199_v18 = vadd.f32 %v1857_v40, %v2767_v27 }
 0x198   :  { %v1170_v21 = vadd.f32 %v1836_v20, %v2767_v27  ;;  %v1202_v36 = vadd.f32 %v1860_v50, %v2767_v27  ;;  %v1839_v3 = vadd.f32 %v2666_v63, %v2659_v62  ;;  %v1863_v1 = vadd.f32 %v2668_v44, %v2661_v53  ;;  %v1846_v13 = vpop.f32.mrf.mxu0  ;;  %v1870_v34 = vpop.f32.mrf.mxu1 }
 0x199   :  { %v1329_v0 = vadd.f32 %v1230_v48, %v1225_v33  ;;  %v1235_v60 = vmax.f32 %v1167_v46, 0.0  ;;  %v1842_v32 = vadd.f32 %v1841_v55, %v1840_v37  ;;  %v1866_v38 = vadd.f32 %v1865_v28, %v1864_v61 }
 0x19a   :  { %v1240_v52 = vmax.f32 %v1170_v21, 0.0  ;;  %v1280_v41 = vmax.f32 %v1202_v36, 0.0  ;;  %v1175_v26 = vadd.f32 %v1839_v3, %v2767_v27  ;;  %v1207_v11 = vadd.f32 %v1863_v1, %v2767_v27 }
 0x19b   :  { %v1552_v24 = vadd.f32 %v1551_v4, %v1550_v29  ;;  %v1572_v42 = vrot.slane %v1571_v9, 1  ;;  %v1178_v62 = vadd.f32 %v1842_v32, %v2767_v27  ;;  %v1210_v63 = vadd.f32 %v1866_v38, %v2767_v27 }
 0x19c   :  { %v1559_v53 = vadd.f32 %v1558_v19, %v1557_v43  ;;  %v1469_v44 = vadd.f32 %v1270_v17, %v1265_v51  ;;  %v1275_v58 = vmax.f32 %v1199_v18, 0.0  ;;  %v1364_v37 = vadd.f32 %v1240_v52, %v1235_v60 }
 0x19d   :  { %v1245_v61 = vmax.f32 %v1175_v26, 0.0  ;;  %v1285_v12 = vmax.f32 %v1207_v11, 0.0  ;;  %v1250_v35 = vmax.f32 %v1178_v62, 0.0  ;;  %v1290_v16 = vmax.f32 %v1210_v63, 0.0 }
 0x19e   :  { %v1566_v23 = vadd.f32 %v1565_v2, %v1564_v49  ;;  %v1330_v8 = vrot.slane %v1329_v0, 4  ;;  %v1365_v45 = vrot.slane %v1364_v37, 4  ;;  %v1504_v55 = vadd.f32 %v1280_v41, %v1275_v58  ;;  %v1847_v49 = vpop.f32.mrf.mxu0  ;;  %v1871_v2 = vpop.f32.mrf.mxu1 }
 0x19f   :  { %v1573_v29 = vadd.f32 %v1572_v42, %v1571_v9  ;;  %v1399_v28 = vadd.f32 %v1250_v35, %v1245_v61  ;;  %v1539_v10 = vadd.f32 %v1290_v16, %v1285_v12  ;;  %v1845_v31 = vadd.f32 %v1844_v39, %v1843_v6 }
 0x1a0   :  { %v1687_v57 = vsel %vm1671_vm5, %v1613_v47, %v2682_v14  ;;  %v1680_v43 = vsel %vm1671_vm5, %v1612_v54, %v2689_v56  ;;  %v1366_v5 = vadd.f32 %v1365_v45, %v1364_v37  ;;  %v1869_v25 = vadd.f32 %v1868_v7, %v1867_v15 }
 0x1a1   :  { %v1616_v40 = vmul.f32 0.0625, %v1552_v24  ;;  %v1617_v4 = vmul.f32 0.0625, %v1559_v53  ;;  %v1470_v48 = vrot.slane %v1469_v44, 4  ;;  %v1400_v46 = vrot.slane %v1399_v28, 4 }
 0x1a2   :  { %v1694_v9 = vsel %vm1671_vm5, %v2705_v59, %v2693_v22  ;;  %v1618_v33 = vmul.f32 0.0625, %v1566_v23  ;;  %v1331_v6 = vadd.f32 %v1330_v8, %v1329_v0  ;;  %v1505_v20 = vrot.slane %v1504_v55, 4 }
 0x1a3   :  { %v1619_v50 = vmul.f32 0.0625, %v1573_v29  ;;  %v1401_v14 = vadd.f32 %v1400_v46, %v1399_v28  ;;  %v1540_v47 = vrot.slane %v1539_v10, 4  ;;  %v1183_v56 = vadd.f32 %v1845_v31, %v2767_v27 }
 0x1a4   :  { %v1367_v54 = vrot.slane %v1366_v5, 2  ;;  %v1215_v15 = vadd.f32 %v1869_v25, %v2767_v27  ;;  %v1848_v19 = vadd.f32 %v1847_v49, %v1846_v13  ;;  %v1872_v51 = vadd.f32 %v1871_v2, %v1870_v34 }
 0x1a5   :  { %v1471_v17 = vadd.f32 %v1470_v48, %v1469_v44  ;;  %v1402_v18 = vrot.slane %v1401_v14, 2  ;;  %v1674_v21 = vsel %vm1673_vm6, %v1616_v40, %v2703_v30  ;;  %v1681_v22 = vsel %vm1673_vm6, %v1617_v4, %v1680_v43 }
 0x1a6   :  { %v1332_v59 = vrot.slane %v1331_v6, 2  ;;  %v1506_v36 = vadd.f32 %v1505_v20, %v1504_v55  ;;  %v1186_v3 = vadd.f32 %v1848_v19, %v2767_v27  ;;  %v1218_v1 = vadd.f32 %v1872_v51, %v2767_v27  ;;  %1708 = vst [vmem:[#allocation8] sm:$0xff] %v1674_v21  ;;  %1709 = vst [vmem:[#allocation8 + $0x8] sm:$0xff] %v1681_v22 }
 0x1a7   :  { %v1541_v0 = vadd.f32 %v1540_v47, %v1539_v10  ;;  %v1255_v60 = vmax.f32 %v1183_v56, 0.0  ;;  %v1688_v32 = vsel %vm1673_vm6, %v1618_v33, %v1687_v57  ;;  %v1695_v38 = vsel %vm1673_vm6, %v1619_v50, %v1694_v9 }
 0x1a8   :  { %v1368_v39 = vadd.f32 %v1367_v54, %v1366_v5  ;;  %v1295_v7 = vmax.f32 %v1215_v15, 0.0  ;;  %v1260_v52 = vmax.f32 %v1186_v3, 0.0  ;;  %v1300_v30 = vmax.f32 %v1218_v1, 0.0  ;;  %1710 = vst [vmem:[#allocation8 + $0x10] sm:$0xff] %v1688_v32  ;;  %1711 = vst [vmem:[#allocation8 + $0x18] sm:$0xff] %v1695_v38 }
 0x1a9   :  { %v1472_v41 = vrot.slane %v1471_v17, 2  ;;  %v1403_v26 = vadd.f32 %v1402_v18, %v1401_v14  ;;  %v1333_v11 = vadd.f32 %v1332_v59, %v1331_v6  ;;  %v1507_v24 = vrot.slane %v1506_v36, 2 }
 0x1aa   :  { %v1434_v42 = vadd.f32 %v1260_v52, %v1255_v60  ;;  %v1574_v27 = vadd.f32 %v1300_v30, %v1295_v7  ;;  %v1542_v62 = vrot.slane %v1541_v0, 2  ;;  %v1369_v63 = vrot.slane %v1368_v39, 1 }
 0x1ab   :  { %v1473_v58 = vadd.f32 %v1472_v41, %v1471_v17  ;;  %v1404_v37 = vrot.slane %v1403_v26, 1  ;;  %v1334_v61 = vrot.slane %v1333_v11, 1  ;;  %v1508_v12 = vadd.f32 %v1507_v24, %v1506_v36 }
 0x1ac   :  { %v1435_v53 = vrot.slane %v1434_v42, 4  ;;  %v1575_v44 = vrot.slane %v1574_v27, 4  ;;  %v1543_v13 = vadd.f32 %v1542_v62, %v1541_v0  ;;  %v1370_v34 = vadd.f32 %v1369_v63, %v1368_v39 }
 0x1ad   :  { %v1474_v45 = vrot.slane %v1473_v58, 1  ;;  %v1405_v55 = vadd.f32 %v1404_v37, %v1403_v26  ;;  %v1335_v29 = vadd.f32 %v1334_v61, %v1333_v11  ;;  %v1509_v28 = vrot.slane %v1508_v12, 1 }
 0x1ae   :  { %v1436_v35 = vadd.f32 %v1435_v53, %v1434_v42  ;;  %v1576_v16 = vadd.f32 %v1575_v44, %v1574_v27  ;;  %v1544_v57 = vrot.slane %v1543_v13, 1  ;;  %v1590_v43 = vmul.f32 0.0625, %v1370_v34 }
 0x1af   :  { %v1475_v40 = vadd.f32 %v1474_v45, %v1473_v58  ;;  %v1595_v4 = vmul.f32 0.0625, %v1405_v55  ;;  %v1585_v48 = vmul.f32 0.0625, %v1335_v29  ;;  %v1510_v46 = vadd.f32 %v1509_v28, %v1508_v12 }
 0x1b0   :  { %v1437_v23 = vrot.slane %v1436_v35, 2  ;;  %v1577_v8 = vrot.slane %v1576_v16, 2  ;;  %v1545_v2 = vadd.f32 %v1544_v57, %v1543_v13 }
 0x1b1   :  { %v1696_v9 = vsel %vm1661_vm0, %v1590_v43, %v1585_v48  ;;  %v1605_v20 = vmul.f32 0.0625, %v1475_v40  ;;  %v1610_v14 = vmul.f32 0.0625, %v1510_v46 }
 0x1b2   :  { %v1438_v10 = vadd.f32 %v1437_v23, %v1436_v35  ;;  %v1578_v31 = vadd.f32 %v1577_v8, %v1576_v16  ;;  %v1697_v50 = vsel %vm1663_vm1, %v1595_v4, %v1696_v9  ;;  %v1615_v56 = vmul.f32 0.0625, %v1545_v2 }
 0x1b4   :  { %v1439_v5 = vrot.slane %v1438_v10, 1  ;;  %v1579_v25 = vrot.slane %v1578_v31, 1 }
 0x1b6   :  { %v1440_v49 = vadd.f32 %v1439_v5, %v1438_v10  ;;  %v1580_v6 = vadd.f32 %v1579_v25, %v1578_v31 }
 0x1b8   :  { %v1600_v33 = vmul.f32 0.0625, %v1440_v49  ;;  %v1620_v15 = vmul.f32 0.0625, %v1580_v6 }
 0x1ba   :  { %v1698_v47 = vsel %vm1665_vm2, %v1600_v33, %v1697_v50 }
 0x1bb   :  { %v1699_v54 = vsel %vm1667_vm3, %v1605_v20, %v1698_v47 }
 0x1bc   :  { %v1700_v19 = vsel %vm1669_vm4, %v1610_v14, %v1699_v54 }
 0x1bd   :  { %v1701_v51 = vsel %vm1671_vm5, %v1615_v56, %v1700_v19 }
 0x1be   :  { %v1702_v17 = vsel %vm1673_vm6, %v1620_v15, %v1701_v51 }
 0x1bf   :  { %1712 = vst [vmem:[#allocation8 + $0x20] sm:$0xff] %v1702_v17 }
 0x1c0   :  { %2080 = shalt.err (!%p2077_p5)
}
 0x1c1   :  { %1722 = dma.vmem_to_hbm [thread:$0]  %s1720_s2, 640, %s2752_s3, [#allocation4]  }
 0x1c2   :  { %2093 = dma.done.wait [#allocation4], 640  }
 0x1c3   :  { %2094 = vsyncadd [#allocation4], 4294966656 }
 0x1c4   :  { %1726 = vsyncpa [#allocation3], 1 }
 0x1c5   :  { %1727 = vsyncpa [#allocation6], 1 }
 0x1c6   :  { %1728 = vsyncpa [#allocation4], 1 }

</bundles_post_ra>
